<compile_context>
chip_gen: v6e
topology: v6e:2x2x1
jax: 0.10.0
libtpu: 0.0.40
codegen_flags: <defaults>
</compile_context>

<pallas_src>
import functools

import jax
import jax.numpy as jnp
from jax.experimental import pallas as pl
from jax.experimental.pallas import tpu as pltpu

LANE = 128                      # lane (last-dim) padding target
SUBLANE = 8                     # f32 sublane padding target
VMEM = pltpu.MemorySpace.VMEM


def _vspec():
    # whole-array block resident in VMEM (everything here is tiny after padding)
    return pl.BlockSpec(memory_space=VMEM)


# ---------------- fused Pallas kernel ----------------

def _fused_gnn_kernel(num_gc_layers,
                      adj_ref,            # [Np, Np]   Â = A + I   (self-loop folded, eps=0)
                      x_ref,              # [Np, 128]  node features, lane-padded
                      w1_ref, b1_ref,     # [L,128,128], [L,1,128]
                      w2_ref, b2_ref,     # [L,128,128], [L,1,128]
                      pmat_ref,           # [Gp, Np]   pooling one-hot (global_add_pool)
                      pw1_ref, pb1_ref,   # proj_head linear 1
                      pw2_ref, pb2_ref,   # proj_head linear 2
                      fw_ref, fb_ref,     # fc
                      z_ref, p_ref):      # [Gp,128], [Gp,128]  lane-dense padded outputs
    x = x_ref[...]
    adj = adj_ref[...]

    # ---- GIN layers (unrolled; L is a small static int) ----
    for i in range(num_gc_layers):
        # aggregation with folded self-loop:  h = (A + I) @ x  ==  x + sum_neighbors(x)
        h = jnp.dot(adj, x, preferred_element_type=jnp.float32)
        # GIN MLP: Linear -> ReLU -> Linear, then the outer F.relu of Encoder.forward
        h1 = jnp.dot(h, w1_ref[i], preferred_element_type=jnp.float32) + b1_ref[i]
        h1 = jnp.maximum(h1, 0.0)
        h2 = jnp.dot(h1, w2_ref[i], preferred_element_type=jnp.float32) + b2_ref[i]
        x = jnp.maximum(h2, 0.0)

    # ---- global_add_pool as a matmul: xpool[g] = sum_{n : batch[n]==g} x[n] ----
    xpool = jnp.dot(pmat_ref[...], x, preferred_element_type=jnp.float32)

    # ---- proj_head: Linear -> ReLU -> Linear ----
    ph = jnp.dot(xpool, pw1_ref[...], preferred_element_type=jnp.float32) + pb1_ref[...]
    ph = jnp.maximum(ph, 0.0)
    z_ref[...] = jnp.dot(ph, pw2_ref[...], preferred_element_type=jnp.float32) + pb2_ref[...]

    # ---- fc: Linear ----
    p_ref[...] = jnp.dot(xpool, fw_ref[...], preferred_element_type=jnp.float32) + fb_ref[...]


# ---------------- wrappers ----------------

def _pad_to(x, shape):
    pads = [(0, t - s) for s, t in zip(x.shape, shape)]
    return jnp.pad(x, pads)


def _round_up(n, m):
    return ((n + m - 1) // m) * m


def make_forward(num_features, hidden_dim, num_gc_layers, num_classes):
    """Returns a jitted forward(x, adj, pmat, params) -> (z, p)."""
    assert num_features <= LANE and hidden_dim <= LANE and num_classes <= LANE

    @jax.jit
    def forward(x, adj, pmat, params):
        n = x.shape[0]
        g = pmat.shape[0]
        # node dim padded to a lane multiple so the aggregation / pooling matmuls have
        # a lane-dense contraction dim on the MXU; graph dim padded to sublanes.
        n_pad = max(LANE, _round_up(n, LANE))
        g_pad = max(SUBLANE, _round_up(g, SUBLANE))

        # fold the GIN self-loop (eps = 0) into the adjacency:  Â = A + I
        adj_hat = adj + jnp.eye(n, dtype=adj.dtype)
        adj_p = _pad_to(adj_hat, (n_pad, n_pad))
        x_p = _pad_to(x, (n_pad, LANE))
        pmat_p = _pad_to(pmat, (g_pad, n_pad))

        # stack + lane-pad per-layer GIN MLP weights (layer 0 input rows beyond
        # num_features are zero, so padded x columns contribute nothing)
        W1 = jnp.stack([_pad_to(w1, (LANE, LANE)) for (w1, _, _, _) in params["layers"]])
        B1 = jnp.stack([_pad_to(b1, (1, LANE)) for (_, b1, _, _) in params["layers"]])
        W2 = jnp.stack([_pad_to(w2, (LANE, LANE)) for (_, _, w2, _) in params["layers"]])
        B2 = jnp.stack([_pad_to(b2, (1, LANE)) for (_, _, _, b2) in params["layers"]])

        pw1 = _pad_to(params["proj_w1"], (LANE, LANE))
        pb1 = _pad_to(params["proj_b1"], (1, LANE))
        pw2 = _pad_to(params["proj_w2"], (LANE, LANE))
        pb2 = _pad_to(params["proj_b2"], (1, LANE))
        fw = _pad_to(params["fc_w"], (LANE, LANE))
        fb = _pad_to(params["fc_b"], (1, LANE))

        kernel = functools.partial(_fused_gnn_kernel, num_gc_layers)
        z_pad, p_pad = pl.pallas_call(
            kernel,
            out_shape=(jax.ShapeDtypeStruct((g_pad, LANE), jnp.float32),
                       jax.ShapeDtypeStruct((g_pad, LANE), jnp.float32)),
            in_specs=[_vspec()] * 13,
            out_specs=(_vspec(), _vspec()),
            compiler_params=pltpu.CompilerParams(vmem_limit_bytes=64 << 20),
        )(adj_p, x_p, W1, B1, W2, B2, pmat_p, pw1, pb1, pw2, pb2, fw, fb)

        # slice the lane-dense padded slabs back to the logical shapes (plain JAX)
        return z_pad[:g, :hidden_dim], p_pad[:g, :num_classes]

    return forward


# ---------------- parameter init (deterministic, mimics init_emb) ----------------

def xavier_uniform(key, fan_in, fan_out):
    bound = (6.0 / (fan_in + fan_out)) ** 0.5
    # stored as (in, out) so the kernel computes x @ W directly (== x @ W_torch^T)
    return jax.random.uniform(key, (fan_in, fan_out), jnp.float32, -bound, bound)


def init_params(key, num_features, hidden_dim, num_gc_layers, num_classes):
    params = {"layers": []}
    for i in range(num_gc_layers):
        fin = num_features if i == 0 else hidden_dim
        key, k1, k2 = jax.random.split(key, 3)
        w1 = xavier_uniform(k1, fin, hidden_dim)
        w2 = xavier_uniform(k2, hidden_dim, hidden_dim)
        params["layers"].append((w1, jnp.zeros((1, hidden_dim), jnp.float32),
                                 w2, jnp.zeros((1, hidden_dim), jnp.float32)))
    key, k1, k2, k3 = jax.random.split(key, 4)
    params["proj_w1"] = xavier_uniform(k1, hidden_dim, hidden_dim)
    params["proj_b1"] = jnp.zeros((1, hidden_dim), jnp.float32)
    params["proj_w2"] = xavier_uniform(k2, hidden_dim, hidden_dim)
    params["proj_b2"] = jnp.zeros((1, hidden_dim), jnp.float32)
    params["fc_w"] = xavier_uniform(k3, hidden_dim, num_classes)
    params["fc_b"] = jnp.zeros((1, num_classes), jnp.float32)
    return params


# ---------------- pure-JAX reference (for correctness check only) ----------------

def reference_forward(x, adj, pmat, params):
    for (w1, b1, w2, b2) in params["layers"]:
        h = x + adj @ x
        h = jnp.maximum(h @ w1 + b1, 0.0)
        x = jnp.maximum(h @ w2 + b2, 0.0)
    xpool = pmat @ x
    ph = jnp.maximum(xpool @ params["proj_w1"] + params["proj_b1"], 0.0)
    z = ph @ params["proj_w2"] + params["proj_b2"]
    p = xpool @ params["fc_w"] + params["fc_b"]
    return z, p


if __name__ == "__main__":
    # small config consistent with the module's args
    num_features = 8
    hidden_dim = 32
    num_gc_layers = 3
    num_classes = 4

    # two ring graphs of 8 nodes each (16 nodes total), bidirectional edges
    G = 2
    nodes_per_graph = 8
    N = G * nodes_per_graph
    src, dst = [], []
    for g in range(G):
        base = g * nodes_per_graph
        for i in range(nodes_per_graph):
            j = (i + 1) % nodes_per_graph
            src += [base + i, base + j]
            dst += [base + j, base + i]
    edge_index = jnp.array([src, dst], dtype=jnp.int32)          # [2, E]
    batch = jnp.array([g for g in range(G) for _ in range(nodes_per_graph)],
                      dtype=jnp.int32)                           # [N]

    # densify graph structure (glue, outside the kernel)
    adj = jnp.zeros((N, N), jnp.float32).at[edge_index[1], edge_index[0]].add(1.0)
    pmat = (batch[None, :] == jnp.arange(G)[:, None]).astype(jnp.float32)  # [G, N]

    key = jax.random.PRNGKey(0)
    key, kx, kp = jax.random.split(key, 3)
    x = jax.random.normal(kx, (N, num_features), jnp.float32)
    params = init_params(kp, num_features, hidden_dim, num_gc_layers, num_classes)

    forward = make_forward(num_features, hidden_dim, num_gc_layers, num_classes)
    z, p = forward(x, adj, pmat, params)
    jax.block_until_ready((z, p))

    assert z.shape == (G, hidden_dim) and p.shape == (G, num_classes)

    # numerical check against the plain-JAX reference
    z_ref, p_ref = reference_forward(x, adj, pmat, params)
    assert jnp.allclose(z, z_ref, atol=1e-4, rtol=1e-4)
    assert jnp.allclose(p, p_ref, atol=1e-4, rtol=1e-4)

    print("KERNEL_OK")
</pallas_src>

<mosaic_0001>
module attributes {stable_mosaic.version = 11 : i64} {
  func.func @_fused_gnn_kernel(%arg0: memref<128x128xf32, #tpu.memory_space<vmem>>, %arg1: memref<128x128xf32, #tpu.memory_space<vmem>>, %arg2: memref<3x128x128xf32, #tpu.memory_space<vmem>>, %arg3: memref<3x1x128xf32, #tpu.memory_space<vmem>>, %arg4: memref<3x128x128xf32, #tpu.memory_space<vmem>>, %arg5: memref<3x1x128xf32, #tpu.memory_space<vmem>>, %arg6: memref<8x128xf32, #tpu.memory_space<vmem>>, %arg7: memref<128x128xf32, #tpu.memory_space<vmem>>, %arg8: memref<1x128xf32, #tpu.memory_space<vmem>>, %arg9: memref<128x128xf32, #tpu.memory_space<vmem>>, %arg10: memref<1x128xf32, #tpu.memory_space<vmem>>, %arg11: memref<128x128xf32, #tpu.memory_space<vmem>>, %arg12: memref<1x128xf32, #tpu.memory_space<vmem>>, %arg13: memref<8x128xf32, #tpu.memory_space<vmem>>, %arg14: memref<8x128xf32, #tpu.memory_space<vmem>>) attributes {dimension_semantics = [], scalar_prefetch = 0 : i64, scratch_operands = 0 : i64, tpu.core_type = #tpu.core_type<tc>} {
    %c0 = arith.constant 0 : index
    %c0_0 = arith.constant 0 : index
    %0 = vector.load %arg1[%c0, %c0_0] : memref<128x128xf32, #tpu.memory_space<vmem>>, vector<128x128xf32>
    %c0_1 = arith.constant 0 : index
    %c0_2 = arith.constant 0 : index
    %1 = vector.load %arg0[%c0_1, %c0_2] : memref<128x128xf32, #tpu.memory_space<vmem>>, vector<128x128xf32>
    %cst = arith.constant dense<0.000000e+00> : vector<128x128xf32>
    %2 = tpu.matmul %1, %0, %cst {dimension_numbers = #tpu.dot_dimension_numbers<[1], [0], [0], [1], [0, 0, 1, 1], [], []>} : vector<128x128xf32>, vector<128x128xf32>, vector<128x128xf32> -> vector<128x128xf32>
    %c0_3 = arith.constant 0 : index
    %c0_4 = arith.constant 0 : index
    %c0_5 = arith.constant 0 : index
    %3 = vector.load %arg2[%c0_3, %c0_4, %c0_5] : memref<3x128x128xf32, #tpu.memory_space<vmem>>, vector<1x128x128xf32>
    %4 = vector.shape_cast %3 : vector<1x128x128xf32> to vector<128x128xf32>
    %cst_6 = arith.constant dense<0.000000e+00> : vector<128x128xf32>
    %5 = tpu.matmul %2, %4, %cst_6 {dimension_numbers = #tpu.dot_dimension_numbers<[1], [0], [0], [1], [0, 0, 1, 1], [], []>} : vector<128x128xf32>, vector<128x128xf32>, vector<128x128xf32> -> vector<128x128xf32>
    %c0_7 = arith.constant 0 : index
    %c0_8 = arith.constant 0 : index
    %c0_9 = arith.constant 0 : index
    %6 = vector.load %arg3[%c0_7, %c0_8, %c0_9] : memref<3x1x128xf32, #tpu.memory_space<vmem>>, vector<1x1x128xf32>
    %7 = vector.shape_cast %6 : vector<1x1x128xf32> to vector<1x128xf32>
    %8 = vector.broadcast %7 : vector<1x128xf32> to vector<128x128xf32>
    %9 = arith.addf %5, %8 : vector<128x128xf32>
    %cst_10 = arith.constant 0.000000e+00 : f32
    %10 = vector.broadcast %cst_10 : f32 to vector<128x128xf32>
    %11 = arith.maximumf %9, %10 : vector<128x128xf32>
    %c0_11 = arith.constant 0 : index
    %c0_12 = arith.constant 0 : index
    %c0_13 = arith.constant 0 : index
    %12 = vector.load %arg4[%c0_11, %c0_12, %c0_13] : memref<3x128x128xf32, #tpu.memory_space<vmem>>, vector<1x128x128xf32>
    %13 = vector.shape_cast %12 : vector<1x128x128xf32> to vector<128x128xf32>
    %cst_14 = arith.constant dense<0.000000e+00> : vector<128x128xf32>
    %14 = tpu.matmul %11, %13, %cst_14 {dimension_numbers = #tpu.dot_dimension_numbers<[1], [0], [0], [1], [0, 0, 1, 1], [], []>} : vector<128x128xf32>, vector<128x128xf32>, vector<128x128xf32> -> vector<128x128xf32>
    %c0_15 = arith.constant 0 : index
    %c0_16 = arith.constant 0 : index
    %c0_17 = arith.constant 0 : index
    %15 = vector.load %arg5[%c0_15, %c0_16, %c0_17] : memref<3x1x128xf32, #tpu.memory_space<vmem>>, vector<1x1x128xf32>
    %16 = vector.shape_cast %15 : vector<1x1x128xf32> to vector<1x128xf32>
    %17 = vector.broadcast %16 : vector<1x128xf32> to vector<128x128xf32>
    %18 = arith.addf %14, %17 : vector<128x128xf32>
    %cst_18 = arith.constant 0.000000e+00 : f32
    %19 = vector.broadcast %cst_18 : f32 to vector<128x128xf32>
    %20 = arith.maximumf %18, %19 : vector<128x128xf32>
    %cst_19 = arith.constant dense<0.000000e+00> : vector<128x128xf32>
    %21 = tpu.matmul %1, %20, %cst_19 {dimension_numbers = #tpu.dot_dimension_numbers<[1], [0], [0], [1], [0, 0, 1, 1], [], []>} : vector<128x128xf32>, vector<128x128xf32>, vector<128x128xf32> -> vector<128x128xf32>
    %c1 = arith.constant 1 : index
    %c0_20 = arith.constant 0 : index
    %c0_21 = arith.constant 0 : index
    %22 = vector.load %arg2[%c1, %c0_20, %c0_21] : memref<3x128x128xf32, #tpu.memory_space<vmem>>, vector<1x128x128xf32>
    %23 = vector.shape_cast %22 : vector<1x128x128xf32> to vector<128x128xf32>
    %cst_22 = arith.constant dense<0.000000e+00> : vector<128x128xf32>
    %24 = tpu.matmul %21, %23, %cst_22 {dimension_numbers = #tpu.dot_dimension_numbers<[1], [0], [0], [1], [0, 0, 1, 1], [], []>} : vector<128x128xf32>, vector<128x128xf32>, vector<128x128xf32> -> vector<128x128xf32>
    %c1_23 = arith.constant 1 : index
    %c0_24 = arith.constant 0 : index
    %c0_25 = arith.constant 0 : index
    %25 = vector.load %arg3[%c1_23, %c0_24, %c0_25] : memref<3x1x128xf32, #tpu.memory_space<vmem>>, vector<1x1x128xf32>
    %26 = vector.shape_cast %25 : vector<1x1x128xf32> to vector<1x128xf32>
    %27 = vector.broadcast %26 : vector<1x128xf32> to vector<128x128xf32>
    %28 = arith.addf %24, %27 : vector<128x128xf32>
    %cst_26 = arith.constant 0.000000e+00 : f32
    %29 = vector.broadcast %cst_26 : f32 to vector<128x128xf32>
    %30 = arith.maximumf %28, %29 : vector<128x128xf32>
    %c1_27 = arith.constant 1 : index
    %c0_28 = arith.constant 0 : index
    %c0_29 = arith.constant 0 : index
    %31 = vector.load %arg4[%c1_27, %c0_28, %c0_29] : memref<3x128x128xf32, #tpu.memory_space<vmem>>, vector<1x128x128xf32>
    %32 = vector.shape_cast %31 : vector<1x128x128xf32> to vector<128x128xf32>
    %cst_30 = arith.constant dense<0.000000e+00> : vector<128x128xf32>
    %33 = tpu.matmul %30, %32, %cst_30 {dimension_numbers = #tpu.dot_dimension_numbers<[1], [0], [0], [1], [0, 0, 1, 1], [], []>} : vector<128x128xf32>, vector<128x128xf32>, vector<128x128xf32> -> vector<128x128xf32>
    %c1_31 = arith.constant 1 : index
    %c0_32 = arith.constant 0 : index
    %c0_33 = arith.constant 0 : index
    %34 = vector.load %arg5[%c1_31, %c0_32, %c0_33] : memref<3x1x128xf32, #tpu.memory_space<vmem>>, vector<1x1x128xf32>
    %35 = vector.shape_cast %34 : vector<1x1x128xf32> to vector<1x128xf32>
    %36 = vector.broadcast %35 : vector<1x128xf32> to vector<128x128xf32>
    %37 = arith.addf %33, %36 : vector<128x128xf32>
    %cst_34 = arith.constant 0.000000e+00 : f32
    %38 = vector.broadcast %cst_34 : f32 to vector<128x128xf32>
    %39 = arith.maximumf %37, %38 : vector<128x128xf32>
    %cst_35 = arith.constant dense<0.000000e+00> : vector<128x128xf32>
    %40 = tpu.matmul %1, %39, %cst_35 {dimension_numbers = #tpu.dot_dimension_numbers<[1], [0], [0], [1], [0, 0, 1, 1], [], []>} : vector<128x128xf32>, vector<128x128xf32>, vector<128x128xf32> -> vector<128x128xf32>
    %c2 = arith.constant 2 : index
    %c0_36 = arith.constant 0 : index
    %c0_37 = arith.constant 0 : index
    %41 = vector.load %arg2[%c2, %c0_36, %c0_37] : memref<3x128x128xf32, #tpu.memory_space<vmem>>, vector<1x128x128xf32>
    %42 = vector.shape_cast %41 : vector<1x128x128xf32> to vector<128x128xf32>
    %cst_38 = arith.constant dense<0.000000e+00> : vector<128x128xf32>
    %43 = tpu.matmul %40, %42, %cst_38 {dimension_numbers = #tpu.dot_dimension_numbers<[1], [0], [0], [1], [0, 0, 1, 1], [], []>} : vector<128x128xf32>, vector<128x128xf32>, vector<128x128xf32> -> vector<128x128xf32>
    %c2_39 = arith.constant 2 : index
    %c0_40 = arith.constant 0 : index
    %c0_41 = arith.constant 0 : index
    %44 = vector.load %arg3[%c2_39, %c0_40, %c0_41] : memref<3x1x128xf32, #tpu.memory_space<vmem>>, vector<1x1x128xf32>
    %45 = vector.shape_cast %44 : vector<1x1x128xf32> to vector<1x128xf32>
    %46 = vector.broadcast %45 : vector<1x128xf32> to vector<128x128xf32>
    %47 = arith.addf %43, %46 : vector<128x128xf32>
    %cst_42 = arith.constant 0.000000e+00 : f32
    %48 = vector.broadcast %cst_42 : f32 to vector<128x128xf32>
    %49 = arith.maximumf %47, %48 : vector<128x128xf32>
    %c2_43 = arith.constant 2 : index
    %c0_44 = arith.constant 0 : index
    %c0_45 = arith.constant 0 : index
    %50 = vector.load %arg4[%c2_43, %c0_44, %c0_45] : memref<3x128x128xf32, #tpu.memory_space<vmem>>, vector<1x128x128xf32>
    %51 = vector.shape_cast %50 : vector<1x128x128xf32> to vector<128x128xf32>
    %cst_46 = arith.constant dense<0.000000e+00> : vector<128x128xf32>
    %52 = tpu.matmul %49, %51, %cst_46 {dimension_numbers = #tpu.dot_dimension_numbers<[1], [0], [0], [1], [0, 0, 1, 1], [], []>} : vector<128x128xf32>, vector<128x128xf32>, vector<128x128xf32> -> vector<128x128xf32>
    %c2_47 = arith.constant 2 : index
    %c0_48 = arith.constant 0 : index
    %c0_49 = arith.constant 0 : index
    %53 = vector.load %arg5[%c2_47, %c0_48, %c0_49] : memref<3x1x128xf32, #tpu.memory_space<vmem>>, vector<1x1x128xf32>
    %54 = vector.shape_cast %53 : vector<1x1x128xf32> to vector<1x128xf32>
    %55 = vector.broadcast %54 : vector<1x128xf32> to vector<128x128xf32>
    %56 = arith.addf %52, %55 : vector<128x128xf32>
    %cst_50 = arith.constant 0.000000e+00 : f32
    %57 = vector.broadcast %cst_50 : f32 to vector<128x128xf32>
    %58 = arith.maximumf %56, %57 : vector<128x128xf32>
    %c0_51 = arith.constant 0 : index
    %c0_52 = arith.constant 0 : index
    %59 = vector.load %arg6[%c0_51, %c0_52] : memref<8x128xf32, #tpu.memory_space<vmem>>, vector<8x128xf32>
    %cst_53 = arith.constant dense<0.000000e+00> : vector<8x128xf32>
    %60 = tpu.matmul %59, %58, %cst_53 {dimension_numbers = #tpu.dot_dimension_numbers<[1], [0], [0], [1], [0, 0, 1, 1], [], []>} : vector<8x128xf32>, vector<128x128xf32>, vector<8x128xf32> -> vector<8x128xf32>
    %c0_54 = arith.constant 0 : index
    %c0_55 = arith.constant 0 : index
    %61 = vector.load %arg7[%c0_54, %c0_55] : memref<128x128xf32, #tpu.memory_space<vmem>>, vector<128x128xf32>
    %cst_56 = arith.constant dense<0.000000e+00> : vector<8x128xf32>
    %62 = tpu.matmul %60, %61, %cst_56 {dimension_numbers = #tpu.dot_dimension_numbers<[1], [0], [0], [1], [0, 0, 1, 1], [], []>} : vector<8x128xf32>, vector<128x128xf32>, vector<8x128xf32> -> vector<8x128xf32>
    %c0_57 = arith.constant 0 : index
    %c0_58 = arith.constant 0 : index
    %63 = vector.load %arg8[%c0_57, %c0_58] : memref<1x128xf32, #tpu.memory_space<vmem>>, vector<1x128xf32>
    %64 = vector.broadcast %63 : vector<1x128xf32> to vector<8x128xf32>
    %65 = arith.addf %62, %64 : vector<8x128xf32>
    %cst_59 = arith.constant 0.000000e+00 : f32
    %66 = vector.broadcast %cst_59 : f32 to vector<8x128xf32>
    %67 = arith.maximumf %65, %66 : vector<8x128xf32>
    %c0_60 = arith.constant 0 : index
    %c0_61 = arith.constant 0 : index
    %68 = vector.load %arg9[%c0_60, %c0_61] : memref<128x128xf32, #tpu.memory_space<vmem>>, vector<128x128xf32>
    %cst_62 = arith.constant dense<0.000000e+00> : vector<8x128xf32>
    %69 = tpu.matmul %67, %68, %cst_62 {dimension_numbers = #tpu.dot_dimension_numbers<[1], [0], [0], [1], [0, 0, 1, 1], [], []>} : vector<8x128xf32>, vector<128x128xf32>, vector<8x128xf32> -> vector<8x128xf32>
    %c0_63 = arith.constant 0 : index
    %c0_64 = arith.constant 0 : index
    %70 = vector.load %arg10[%c0_63, %c0_64] : memref<1x128xf32, #tpu.memory_space<vmem>>, vector<1x128xf32>
    %71 = vector.broadcast %70 : vector<1x128xf32> to vector<8x128xf32>
    %72 = arith.addf %69, %71 : vector<8x128xf32>
    %c0_65 = arith.constant 0 : index
    %c0_66 = arith.constant 0 : index
    %73 = vector.load %arg13[%c0_65, %c0_66] : memref<8x128xf32, #tpu.memory_space<vmem>>, vector<8x128xf32>
    tpu.vector_store %arg13[%c0_65, %c0_66], %72 {strides = array<i32>} : memref<8x128xf32, #tpu.memory_space<vmem>>, vector<8x128xf32>,
    %c0_67 = arith.constant 0 : index
    %c0_68 = arith.constant 0 : index
    %74 = vector.load %arg11[%c0_67, %c0_68] : memref<128x128xf32, #tpu.memory_space<vmem>>, vector<128x128xf32>
    %cst_69 = arith.constant dense<0.000000e+00> : vector<8x128xf32>
    %75 = tpu.matmul %60, %74, %cst_69 {dimension_numbers = #tpu.dot_dimension_numbers<[1], [0], [0], [1], [0, 0, 1, 1], [], []>} : vector<8x128xf32>, vector<128x128xf32>, vector<8x128xf32> -> vector<8x128xf32>
    %c0_70 = arith.constant 0 : index
    %c0_71 = arith.constant 0 : index
    %76 = vector.load %arg12[%c0_70, %c0_71] : memref<1x128xf32, #tpu.memory_space<vmem>>, vector<1x128xf32>
    %77 = vector.broadcast %76 : vector<1x128xf32> to vector<8x128xf32>
    %78 = arith.addf %75, %77 : vector<8x128xf32>
    %c0_72 = arith.constant 0 : index
    %c0_73 = arith.constant 0 : index
    %79 = vector.load %arg14[%c0_72, %c0_73] : memref<8x128xf32, #tpu.memory_space<vmem>>, vector<8x128xf32>
    tpu.vector_store %arg14[%c0_72, %c0_73], %78 {strides = array<i32>} : memref<8x128xf32, #tpu.memory_space<vmem>>, vector<8x128xf32>,
    return
  }
}

</mosaic_0001>

<bundles_post_ra>
// kernel: forward.1
= control target key start
LH: loop header
LB: loop body
LE: loop exit
PB: predicated region body
PF: predicated region fallthrough
CT: control target
= control target key end

     0   :  { %vm3081_vm0 = vmmov 0   ;;  %s3921_s1 = inlined_call_operand.vmem [shape: f32[128,128], index: 1, kind: input, shape index: {}]   ;;  %s3922_s0 = inlined_call_operand.vmem [shape: f32[128,128], index: 0, kind: input, shape index: {}]   ;;  %s3923_s2 = inlined_call_operand.vmem [shape: f32[3,128,128], index: 2, kind: input, shape index: {}]   ;;  %s3924_s4 = inlined_call_operand.vmem [shape: f32[3,128,128], index: 4, kind: input, shape index: {}]   ;;  %s3925_s3 = inlined_call_operand.vmem [shape: f32[3,1,128], index: 3, kind: input, shape index: {}]   ;;  %s3926_s5 = inlined_call_operand.vmem [shape: f32[3,1,128], index: 5, kind: input, shape index: {}]   ;;  %s3927_s7 = inlined_call_operand.vmem [shape: f32[128,128], index: 7, kind: input, shape index: {}]   ;;  %s3928_s6 = inlined_call_operand.vmem [shape: f32[8,128], index: 6, kind: input, shape index: {}]   ;;  %s3929_s9 = inlined_call_operand.vmem [shape: f32[128,128], index: 9, kind: input, shape index: {}]   ;;  %s3930_s11 = inlined_call_operand.vmem [shape: f32[128,128], index: 11, kind: input, shape index: {}]   ;;  %s3931_s8 = inlined_call_operand.vmem [shape: f32[1,128], index: 8, kind: input, shape index: {}]   ;;  %s3932_s12 = inlined_call_operand.vmem [shape: f32[1,128], index: 12, kind: input, shape index: {}]   ;;  %s3933_s14 = inlined_call_operand.vmem [shape: f32[8,128], index: 14, kind: output, shape index: {1}]   ;;  %s3934_s10 = inlined_call_operand.vmem [shape: f32[1,128], index: 10, kind: input, shape index: {}]   ;;  %s3935_s13 = inlined_call_operand.vmem [shape: f32[8,128], index: 13, kind: output, shape index: {0}]  }
   0x1   :  { %v61_v0 = vld [vmem:[%s3921_s1 + $0x78] sm:$0xff]  ;;  %v60_v1 = vld [vmem:[%s3921_s1 + $0x70] sm:$0xff]  ;;  %v59_v2 = vld [vmem:[%s3921_s1 + $0x68] sm:$0xff] }
   0x2   :  { %2419 = vmatprep.subr.mxu0 %v61_v0  ;;  %v58_v3 = vld [vmem:[%s3921_s1 + $0x60] sm:$0xff]  ;;  %v57_v5 = vld [vmem:[%s3921_s1 + $0x58] sm:$0xff]  ;;  %v56_v6 = vld [vmem:[%s3921_s1 + $0x50] sm:$0xff] }
   0x3   :  { %2420 = vmatpush3.msra.mxu0 %v61_v0  ;;  %v3172_v4 = vld [vmem:[%s3922_s0] sm:$0xff]  ;;  %v55_v7 = vld [vmem:[%s3921_s1 + $0x48] sm:$0xff]  ;;  %v238_v8 = vld [vmem:[%s3923_s2 + $0x78] sm:$0xff] }
   0x4   :  { %2421 = vmatprep.subr.mxu0 %v60_v1  ;;  %2451 = vmatprep.mubr.f32.mxu0 %v3172_v4  ;;  %v237_v9 = vld [vmem:[%s3923_s2 + $0x70] sm:$0xff]  ;;  %v54_v10 = vld [vmem:[%s3921_s1 + $0x40] sm:$0xff]  ;;  %v236_v11 = vld [vmem:[%s3923_s2 + $0x68] sm:$0xff] }
   0x5   :  { %2422 = vmatpush3.msra.mxu0 %v60_v1  ;;  %2475 = vmatprep.subr.mxu1 %v238_v8  ;;  %v53_v12 = vld [vmem:[%s3921_s1 + $0x38] sm:$0xff]  ;;  %v235_v13 = vld [vmem:[%s3923_s2 + $0x60] sm:$0xff]  ;;  %v52_v14 = vld [vmem:[%s3921_s1 + $0x30] sm:$0xff] }
   0x6   :  { %2423 = vmatprep.subr.mxu0 %v59_v2  ;;  %2476 = vmatpush3.msra.mxu1 %v238_v8  ;;  %v234_v15 = vld [vmem:[%s3923_s2 + $0x58] sm:$0xff]  ;;  %v51_v16 = vld [vmem:[%s3921_s1 + $0x28] sm:$0xff]  ;;  %v233_v17 = vld [vmem:[%s3923_s2 + $0x50] sm:$0xff] }
   0x7   :  { %2424 = vmatpush3.msra.mxu0 %v59_v2  ;;  %2477 = vmatprep.subr.mxu1 %v237_v9  ;;  %v50_v18 = vld [vmem:[%s3921_s1 + $0x20] sm:$0xff]  ;;  %v232_v19 = vld [vmem:[%s3923_s2 + $0x48] sm:$0xff]  ;;  %v49_v20 = vld [vmem:[%s3921_s1 + $0x18] sm:$0xff] }
   0x8   :  { %2425 = vmatprep.subr.mxu0 %v58_v3  ;;  %2478 = vmatpush3.msra.mxu1 %v237_v9  ;;  %v231_v21 = vld [vmem:[%s3923_s2 + $0x40] sm:$0xff]  ;;  %v48_v22 = vld [vmem:[%s3921_s1 + $0x10] sm:$0xff]  ;;  %v230_v23 = vld [vmem:[%s3923_s2 + $0x38] sm:$0xff] }
   0x9   :  { %2426 = vmatpush3.msra.mxu0 %v58_v3  ;;  %2479 = vmatprep.subr.mxu1 %v236_v11  ;;  %v47_v24 = vld [vmem:[%s3921_s1 + $0x8] sm:$0xff]  ;;  %v229_v25 = vld [vmem:[%s3923_s2 + $0x30] sm:$0xff]  ;;  %v46_v26 = vld [vmem:[%s3921_s1] sm:$0xff] }
   0xa   :  { %2427 = vmatprep.subr.mxu0 %v57_v5  ;;  %2480 = vmatpush3.msra.mxu1 %v236_v11  ;;  %v228_v27 = vld [vmem:[%s3923_s2 + $0x28] sm:$0xff]  ;;  %v227_v29 = vld [vmem:[%s3923_s2 + $0x20] sm:$0xff]  ;;  %v3255_v30 = vld [vmem:[%s3922_s0 + $0x10] sm:$0xff] }
   0xb   :  { %2428 = vmatpush3.msra.mxu0 %v57_v5  ;;  %2481 = vmatprep.subr.mxu1 %v235_v13  ;;  %v3247_v28 = vld [vmem:[%s3922_s0 + $0x8] sm:$0xff]  ;;  %v226_v31 = vld [vmem:[%s3923_s2 + $0x18] sm:$0xff]  ;;  %v225_v33 = vld [vmem:[%s3923_s2 + $0x10] sm:$0xff] }
   0xc   :  { %2429 = vmatprep.subr.mxu0 %v56_v6  ;;  %2482 = vmatpush3.msra.mxu1 %v235_v13  ;;  %v3265_v32 = vld [vmem:[%s3922_s0 + $0x18] sm:$0xff]  ;;  %v3273_v34 = vld [vmem:[%s3922_s0 + $0x20] sm:$0xff]  ;;  %v3280_v35 = vld [vmem:[%s3922_s0 + $0x28] sm:$0xff] }
   0xd   :  { %2430 = vmatpush3.msra.mxu0 %v56_v6  ;;  %2483 = vmatprep.subr.mxu1 %v234_v15  ;;  %v3285_v36 = vld [vmem:[%s3922_s0 + $0x30] sm:$0xff]  ;;  %v3292_v37 = vld [vmem:[%s3922_s0 + $0x38] sm:$0xff]  ;;  %v3297_v38 = vld [vmem:[%s3922_s0 + $0x40] sm:$0xff] }
   0xe   :  { %2431 = vmatprep.subr.mxu0 %v55_v7  ;;  %2484 = vmatpush3.msra.mxu1 %v234_v15  ;;  %v3304_v39 = vld [vmem:[%s3922_s0 + $0x48] sm:$0xff]  ;;  %v3309_v40 = vld [vmem:[%s3922_s0 + $0x50] sm:$0xff]  ;;  %v3316_v41 = vld [vmem:[%s3922_s0 + $0x58] sm:$0xff] }
   0xf   :  { %2432 = vmatpush3.msra.mxu0 %v55_v7  ;;  %2485 = vmatprep.subr.mxu1 %v233_v17  ;;  %v3321_v42 = vld [vmem:[%s3922_s0 + $0x60] sm:$0xff]  ;;  %v3328_v43 = vld [vmem:[%s3922_s0 + $0x68] sm:$0xff]  ;;  %v3333_v44 = vld [vmem:[%s3922_s0 + $0x70] sm:$0xff] }
  0x10   :  { %2433 = vmatprep.subr.mxu0 %v54_v10  ;;  %2486 = vmatpush3.msra.mxu1 %v233_v17  ;;  %v3340_v45 = vld [vmem:[%s3922_s0 + $0x78] sm:$0xff]  ;;  %v224_v46 = vld [vmem:[%s3923_s2 + $0x8] sm:$0xff]  ;;  %v223_v47 = vld [vmem:[%s3923_s2] sm:$0xff] }
  0x11   :  { %2434 = vmatpush3.msra.mxu0 %v54_v10  ;;  %2487 = vmatprep.subr.mxu1 %v232_v19  ;;  %v422_v48 = vld [vmem:[%s3924_s4 + $0x78] sm:$0xff]  ;;  %v421_v49 = vld [vmem:[%s3924_s4 + $0x70] sm:$0xff]  ;;  %v420_v50 = vld [vmem:[%s3924_s4 + $0x68] sm:$0xff] }
  0x12   :  { %2435 = vmatprep.subr.mxu0 %v53_v12  ;;  %2488 = vmatpush3.msra.mxu1 %v232_v19  ;;  %v419_v51 = vld [vmem:[%s3924_s4 + $0x60] sm:$0xff]  ;;  %v418_v52 = vld [vmem:[%s3924_s4 + $0x58] sm:$0xff]  ;;  %v417_v53 = vld [vmem:[%s3924_s4 + $0x50] sm:$0xff] }
  0x13   :  { %2436 = vmatpush3.msra.mxu0 %v53_v12  ;;  %2489 = vmatprep.subr.mxu1 %v231_v21  ;;  %v416_v54 = vld [vmem:[%s3924_s4 + $0x48] sm:$0xff]  ;;  %v415_v55 = vld [vmem:[%s3924_s4 + $0x40] sm:$0xff]  ;;  %v414_v56 = vld [vmem:[%s3924_s4 + $0x38] sm:$0xff] }
  0x14   :  { %2437 = vmatprep.subr.mxu0 %v52_v14  ;;  %2490 = vmatpush3.msra.mxu1 %v231_v21  ;;  %v413_v57 = vld [vmem:[%s3924_s4 + $0x30] sm:$0xff]  ;;  %v412_v58 = vld [vmem:[%s3924_s4 + $0x28] sm:$0xff]  ;;  %v411_v59 = vld [vmem:[%s3924_s4 + $0x20] sm:$0xff] }
  0x15   :  { %2438 = vmatpush3.msra.mxu0 %v52_v14  ;;  %2491 = vmatprep.subr.mxu1 %v230_v23  ;;  %v410_v13 = vld [vmem:[%s3924_s4 + $0x18] sm:$0xff]  ;;  %v409_v14 = vld [vmem:[%s3924_s4 + $0x10] sm:$0xff]  ;;  %v408_v15 = vld [vmem:[%s3924_s4 + $0x8] sm:$0xff] }
  0x16   :  { %2439 = vmatprep.subr.mxu0 %v51_v16  ;;  %2492 = vmatpush3.msra.mxu1 %v230_v23  ;;  %v1986_v17 = vld [vmem:[%s3925_s3] ss:$0 sm:$0xff] }
  0x17   :  { %2440 = vmatpush3.msra.mxu0 %v51_v16  ;;  %2493 = vmatprep.subr.mxu1 %v229_v25  ;;  %v407_v16 = vld [vmem:[%s3924_s4] sm:$0xff] }
  0x18   :  { %2441 = vmatprep.subr.mxu0 %v50_v18  ;;  %2494 = vmatpush3.msra.mxu1 %v229_v25 }
  0x19   :  { %2442 = vmatpush3.msra.mxu0 %v50_v18  ;;  %2495 = vmatprep.subr.mxu1 %v228_v27 }
  0x1a   :  { %2443 = vmatprep.subr.mxu0 %v49_v20  ;;  %2496 = vmatpush3.msra.mxu1 %v228_v27 }
  0x1b   :  { %2444 = vmatpush3.msra.mxu0 %v49_v20  ;;  %2497 = vmatprep.subr.mxu1 %v227_v29 }
  0x1c   :  { %2445 = vmatprep.subr.mxu0 %v48_v22  ;;  %2498 = vmatpush3.msra.mxu1 %v227_v29 }
  0x1d   :  { %2446 = vmatpush3.msra.mxu0 %v48_v22  ;;  %2499 = vmatprep.subr.mxu1 %v226_v31 }
  0x1e   :  { %2447 = vmatprep.subr.mxu0 %v47_v24  ;;  %2500 = vmatpush3.msra.mxu1 %v226_v31 }
  0x1f   :  { %2448 = vmatpush3.msra.mxu0 %v47_v24  ;;  %2501 = vmatprep.subr.mxu1 %v225_v33 }
  0x20   :  { %2449 = vmatprep.subr.mxu0 %v46_v26  ;;  %2502 = vmatpush3.msra.mxu1 %v225_v33 }
  0x21   :  { %2450 = vmatpush3.msra.mxu0 %v46_v26  ;;  %2503 = vmatprep.subr.mxu1 %v224_v46 }
  0x22   :  { %2452 = vmatmul.mubr.f32.vlgmr.msra.gmra.mxu0 %v3247_v28  ;;  %2504 = vmatpush3.msra.mxu1 %v224_v46 }
  0x23   :  { %2454 = vmatprep.mubr.f32.mxu0 %v3255_v30  ;;  %2505 = vmatprep.subr.mxu1 %v223_v47 }
  0x24   :  { %2506 = vmatpush3.msra.mxu1 %v223_v47  ;;  %2531 = vmatprep.subr.mxu0 %v422_v48 }
  0x25   :  { %2532 = vmatpush3.msra.mxu0 %v422_v48 }
  0x26   :  { %2455 = vmatmul.mubr.f32.gmra.mxu0 %v3265_v32  ;;  %2533 = vmatprep.subr.mxu0 %v421_v49 }
  0x27   :  { %2457 = vmatprep.mubr.f32.mxu0 %v3273_v34  ;;  %2534 = vmatpush3.msra.mxu0 %v421_v49 }
  0x28   :  { %2535 = vmatprep.subr.mxu0 %v420_v50 }
  0x29   :  { %2536 = vmatpush3.msra.mxu0 %v420_v50 }
  0x2a   :  { %2458 = vmatmul.mubr.f32.gmra.mxu0 %v3280_v35  ;;  %2537 = vmatprep.subr.mxu0 %v419_v51 }
  0x2b   :  { %2460 = vmatprep.mubr.f32.mxu0 %v3285_v36  ;;  %2538 = vmatpush3.msra.mxu0 %v419_v51 }
  0x2c   :  { %2539 = vmatprep.subr.mxu0 %v418_v52 }
  0x2d   :  { %2540 = vmatpush3.msra.mxu0 %v418_v52 }
  0x2e   :  { %2461 = vmatmul.mubr.f32.gmra.mxu0 %v3292_v37  ;;  %2541 = vmatprep.subr.mxu0 %v417_v53 }
  0x2f   :  { %2463 = vmatprep.mubr.f32.mxu0 %v3297_v38  ;;  %2542 = vmatpush3.msra.mxu0 %v417_v53 }
  0x30   :  { %2543 = vmatprep.subr.mxu0 %v416_v54 }
  0x31   :  { %2544 = vmatpush3.msra.mxu0 %v416_v54 }
  0x32   :  { %2464 = vmatmul.mubr.f32.gmra.mxu0 %v3304_v39  ;;  %2545 = vmatprep.subr.mxu0 %v415_v55 }
  0x33   :  { %2466 = vmatprep.mubr.f32.mxu0 %v3309_v40  ;;  %2546 = vmatpush3.msra.mxu0 %v415_v55 }
  0x34   :  { %2547 = vmatprep.subr.mxu0 %v414_v56 }
  0x35   :  { %2548 = vmatpush3.msra.mxu0 %v414_v56 }
  0x36   :  { %2467 = vmatmul.mubr.f32.gmra.mxu0 %v3316_v41  ;;  %2549 = vmatprep.subr.mxu0 %v413_v57 }
  0x37   :  { %2469 = vmatprep.mubr.f32.mxu0 %v3321_v42  ;;  %2550 = vmatpush3.msra.mxu0 %v413_v57 }
  0x38   :  { %2551 = vmatprep.subr.mxu0 %v412_v58 }
  0x39   :  { %2552 = vmatpush3.msra.mxu0 %v412_v58 }
  0x3a   :  { %2470 = vmatmul.mubr.f32.gmra.mxu0 %v3328_v43  ;;  %2553 = vmatprep.subr.mxu0 %v411_v59 }
  0x3b   :  { %2472 = vmatprep.mubr.f32.mxu0 %v3333_v44  ;;  %2554 = vmatpush3.msra.mxu0 %v411_v59 }
  0x3c   :  { %2555 = vmatprep.subr.mxu0 %v410_v13 }
  0x3d   :  { %2556 = vmatpush3.msra.mxu0 %v410_v13 }
  0x3e   :  { %2473 = vmatmul.mubr.f32.gmra.mxu0 %v3340_v45  ;;  %2557 = vmatprep.subr.mxu0 %v409_v14 }
  0x3f   :  { %2558 = vmatpush3.msra.mxu0 %v409_v14 }
  0x40   :  { %2559 = vmatprep.subr.mxu0 %v408_v15 }
  0x41   :  { %2560 = vmatpush3.msra.mxu0 %v408_v15 }
  0x42   :  { %2561 = vmatprep.subr.mxu0 %v407_v16 }
  0x43   :  { %2562 = vmatpush3.msra.mxu0 %v407_v16 }
  0xe2   :  { %v2453_v60 = vpop.f32.mrf.mxu0 }
  0xe4   :  { %v144_v61 = vpop.f32.mrf.mxu0 }
  0xe5   :  { %2507 = vmatprep.mubr.f32.mxu1 %v144_v61 }
  0xe6   :  { %v2456_v62 = vpop.f32.mrf.mxu0  ;;  %2508 = vmatmul.mubr.f32.vlgmr.msra.gmra.mxu1 %v2453_v60 }
  0xe8   :  { %v154_v63 = vpop.f32.mrf.mxu0 }
  0xe9   :  { %2510 = vmatprep.mubr.f32.mxu1 %v154_v63 }
  0xea   :  { %v2459_v0 = vpop.f32.mrf.mxu0  ;;  %2511 = vmatmul.mubr.f32.gmra.mxu1 %v2456_v62 }
  0xec   :  { %v164_v1 = vpop.f32.mrf.mxu0 }
  0xed   :  { %2513 = vmatprep.mubr.f32.mxu1 %v164_v1 }
  0xee   :  { %v2462_v2 = vpop.f32.mrf.mxu0  ;;  %2514 = vmatmul.mubr.f32.gmra.mxu1 %v2459_v0 }
  0xf0   :  { %v174_v3 = vpop.f32.mrf.mxu0 }
  0xf1   :  { %2516 = vmatprep.mubr.f32.mxu1 %v174_v3 }
  0xf2   :  { %v2465_v5 = vpop.f32.mrf.mxu0  ;;  %2517 = vmatmul.mubr.f32.gmra.mxu1 %v2462_v2 }
  0xf4   :  { %v184_v6 = vpop.f32.mrf.mxu0 }
  0xf5   :  { %2519 = vmatprep.mubr.f32.mxu1 %v184_v6 }
  0xf6   :  { %v2468_v7 = vpop.f32.mrf.mxu0  ;;  %2520 = vmatmul.mubr.f32.gmra.mxu1 %v2465_v5 }
  0xf8   :  { %v194_v8 = vpop.f32.mrf.mxu0 }
  0xf9   :  { %2522 = vmatprep.mubr.f32.mxu1 %v194_v8 }
  0xfa   :  { %v2471_v9 = vpop.f32.mrf.mxu0  ;;  %2523 = vmatmul.mubr.f32.gmra.mxu1 %v2468_v7 }
  0xfc   :  { %v204_v10 = vpop.f32.mrf.mxu0 }
  0xfd   :  { %2525 = vmatprep.mubr.f32.mxu1 %v204_v10 }
  0xfe   :  { %v2474_v11 = vpop.f32.mrf.mxu0  ;;  %2526 = vmatmul.mubr.f32.gmra.mxu1 %v2471_v9 }
 0x100   :  { %v214_v12 = vpop.f32.mrf.mxu0 }
 0x101   :  { %2528 = vmatprep.mubr.f32.mxu1 %v214_v12 }
 0x102   :  { %2529 = vmatmul.mubr.f32.gmra.mxu1 %v2474_v11 }
 0x103   :  { %2619 = vmatprep.mubr.f32.mxu1 %v3172_v4 }
 0x1a6   :  { %v2509_v18 = vpop.f32.mrf.mxu1 }
 0x1a7   :  { %v318_v19 = vadd.f32 %v2509_v18, %v1986_v17 }
 0x1a8   :  { %v312_v20 = vpop.f32.mrf.mxu1 }
 0x1a9   :  { %v313_v21 = vadd.f32 %v1986_v17, %v312_v20  ;;  %v392_v24 = vmax.f32 %v318_v19, 0.0  ;;  %v2003_v19 = vld [vmem:[%s3923_s2 + $0xf8] sm:$0xff]  ;;  %v2002_v20 = vld [vmem:[%s3923_s2 + $0xf0] sm:$0xff] }
 0x1aa   :  { %v2512_v22 = vpop.f32.mrf.mxu1  ;;  %2643 = vmatprep.subr.mxu0 %v2003_v19 }
 0x1ab   :  { %v391_v23 = vmax.f32 %v313_v21, 0.0  ;;  %v328_v25 = vadd.f32 %v2512_v22, %v1986_v17  ;;  %v2000_v21 = vld [vmem:[%s3923_s2 + $0xe0] sm:$0xff]  ;;  %v1999_v22 = vld [vmem:[%s3923_s2 + $0xd8] sm:$0xff] }
 0x1ac   :  { %v322_v26 = vpop.f32.mrf.mxu1 }
 0x1ad   :  { %v323_v27 = vadd.f32 %v1986_v17, %v322_v26  ;;  %2563 = vmatprep.mubr.f32.mxu0 %v391_v23  ;;  %v394_v33 = vmax.f32 %v328_v25, 0.0  ;;  %v1998_v23 = vld [vmem:[%s3923_s2 + $0xd0] sm:$0xff]  ;;  %v1996_v25 = vld [vmem:[%s3923_s2 + $0xc0] sm:$0xff]  ;;  %v1995_v26 = vld [vmem:[%s3923_s2 + $0xb8] sm:$0xff] }
 0x1ae   :  { %v2515_v29 = vpop.f32.mrf.mxu1  ;;  %2564 = vmatmul.mubr.f32.vlgmr.msra.gmra.mxu0 %v392_v24  ;;  %v1997_v24 = vld [vmem:[%s3923_s2 + $0xc8] sm:$0xff] }
 0x1af   :  { %v393_v31 = vmax.f32 %v323_v27, 0.0  ;;  %v338_v46 = vadd.f32 %v2515_v29, %v1986_v17  ;;  %2644 = vmatpush3.msra.mxu0 %v2003_v19  ;;  %v1994_v27 = vld [vmem:[%s3923_s2 + $0xb0] sm:$0xff]  ;;  %v1993_v29 = vld [vmem:[%s3923_s2 + $0xa8] sm:$0xff] }
 0x1b0   :  { %v332_v47 = vpop.f32.mrf.mxu1  ;;  %2645 = vmatprep.subr.mxu0 %v2002_v20 }
 0x1b1   :  { %v333_v48 = vadd.f32 %v1986_v17, %v332_v47  ;;  %2566 = vmatprep.mubr.f32.mxu0 %v393_v31  ;;  %v396_v51 = vmax.f32 %v338_v46, 0.0  ;;  %2646 = vmatpush3.msra.mxu0 %v2002_v20  ;;  %v1992_v31 = vld [vmem:[%s3923_s2 + $0xa0] sm:$0xff]  ;;  %v1990_v46 = vld [vmem:[%s3923_s2 + $0x90] sm:$0xff] }
 0x1b2   :  { %v2518_v49 = vpop.f32.mrf.mxu1  ;;  %2567 = vmatmul.mubr.f32.gmra.mxu0 %v394_v33  ;;  %v1991_v33 = vld [vmem:[%s3923_s2 + $0x98] sm:$0xff] }
 0x1b3   :  { %v395_v50 = vmax.f32 %v333_v48, 0.0  ;;  %v348_v52 = vadd.f32 %v2518_v49, %v1986_v17 }
 0x1b4   :  { %v342_v53 = vpop.f32.mrf.mxu1 }
 0x1b5   :  { %v343_v54 = vadd.f32 %v1986_v17, %v342_v53  ;;  %2569 = vmatprep.mubr.f32.mxu0 %v395_v50  ;;  %v398_v57 = vmax.f32 %v348_v52, 0.0 }
 0x1b6   :  { %v2521_v55 = vpop.f32.mrf.mxu1  ;;  %2570 = vmatmul.mubr.f32.gmra.mxu0 %v396_v51 }
 0x1b7   :  { %v397_v56 = vmax.f32 %v343_v54, 0.0  ;;  %v358_v58 = vadd.f32 %v2521_v55, %v1986_v17 }
 0x1b8   :  { %v352_v59 = vpop.f32.mrf.mxu1 }
 0x1b9   :  { %v353_v60 = vadd.f32 %v1986_v17, %v352_v59  ;;  %2572 = vmatprep.mubr.f32.mxu0 %v397_v56  ;;  %v400_v63 = vmax.f32 %v358_v58, 0.0 }
 0x1ba   :  { %v2524_v61 = vpop.f32.mrf.mxu1  ;;  %2573 = vmatmul.mubr.f32.gmra.mxu0 %v398_v57 }
 0x1bb   :  { %v399_v62 = vmax.f32 %v353_v60, 0.0  ;;  %v368_v0 = vadd.f32 %v2524_v61, %v1986_v17  ;;  %v1987_v61 = vld [vmem:[%s3926_s5] ss:$0 sm:$0xff] }
 0x1bc   :  { %v362_v1 = vpop.f32.mrf.mxu1 }
 0x1bd   :  { %v363_v2 = vadd.f32 %v1986_v17, %v362_v1  ;;  %2575 = vmatprep.mubr.f32.mxu0 %v399_v62  ;;  %v402_v6 = vmax.f32 %v368_v0, 0.0 }
 0x1be   :  { %v2527_v3 = vpop.f32.mrf.mxu1  ;;  %2576 = vmatmul.mubr.f32.gmra.mxu0 %v400_v63 }
 0x1bf   :  { %v401_v5 = vmax.f32 %v363_v2, 0.0  ;;  %v378_v7 = vadd.f32 %v2527_v3, %v1986_v17 }
 0x1c0   :  { %v372_v8 = vpop.f32.mrf.mxu1 }
 0x1c1   :  { %v373_v9 = vadd.f32 %v1986_v17, %v372_v8  ;;  %2578 = vmatprep.mubr.f32.mxu0 %v401_v5  ;;  %v404_v12 = vmax.f32 %v378_v7, 0.0 }
 0x1c2   :  { %v2530_v10 = vpop.f32.mrf.mxu1  ;;  %2579 = vmatmul.mubr.f32.gmra.mxu0 %v402_v6 }
 0x1c3   :  { %v403_v11 = vmax.f32 %v373_v9, 0.0  ;;  %v388_v13 = vadd.f32 %v2530_v10, %v1986_v17 }
 0x1c4   :  { %v382_v14 = vpop.f32.mrf.mxu1 }
 0x1c5   :  { %v383_v15 = vadd.f32 %v1986_v17, %v382_v14  ;;  %2581 = vmatprep.mubr.f32.mxu0 %v403_v11  ;;  %v406_v18 = vmax.f32 %v388_v13, 0.0  ;;  %v2001_v17 = vld [vmem:[%s3923_s2 + $0xe8] sm:$0xff] }
 0x1c6   :  { %2582 = vmatmul.mubr.f32.gmra.mxu0 %v404_v12  ;;  %2647 = vmatprep.subr.mxu0 %v2001_v17 }
 0x1c7   :  { %v405_v16 = vmax.f32 %v383_v15, 0.0  ;;  %2648 = vmatpush3.msra.mxu0 %v2001_v17 }
 0x1c8   :  { %2649 = vmatprep.subr.mxu0 %v2000_v21 }
 0x1c9   :  { %2584 = vmatprep.mubr.f32.mxu0 %v405_v16  ;;  %2650 = vmatpush3.msra.mxu0 %v2000_v21 }
 0x1ca   :  { %2585 = vmatmul.mubr.f32.gmra.mxu0 %v406_v18  ;;  %2651 = vmatprep.subr.mxu0 %v1999_v22 }
 0x1cb   :  { %2652 = vmatpush3.msra.mxu0 %v1999_v22 }
 0x1cc   :  { %2653 = vmatprep.subr.mxu0 %v1998_v23 }
 0x1cd   :  { %2654 = vmatpush3.msra.mxu0 %v1998_v23 }
 0x1ce   :  { %2655 = vmatprep.subr.mxu0 %v1997_v24 }
 0x1cf   :  { %2656 = vmatpush3.msra.mxu0 %v1997_v24 }
 0x1d0   :  { %2657 = vmatprep.subr.mxu0 %v1996_v25 }
 0x1d1   :  { %2658 = vmatpush3.msra.mxu0 %v1996_v25 }
 0x1d2   :  { %2659 = vmatprep.subr.mxu0 %v1995_v26 }
 0x1d3   :  { %2660 = vmatpush3.msra.mxu0 %v1995_v26 }
 0x1d4   :  { %2661 = vmatprep.subr.mxu0 %v1994_v27 }
 0x1d5   :  { %2662 = vmatpush3.msra.mxu0 %v1994_v27 }
 0x1d6   :  { %2663 = vmatprep.subr.mxu0 %v1993_v29 }
 0x1d7   :  { %2664 = vmatpush3.msra.mxu0 %v1993_v29 }
 0x1d8   :  { %2665 = vmatprep.subr.mxu0 %v1992_v31 }
 0x1d9   :  { %2666 = vmatpush3.msra.mxu0 %v1992_v31 }
 0x1da   :  { %2667 = vmatprep.subr.mxu0 %v1991_v33 }
 0x1db   :  { %2668 = vmatpush3.msra.mxu0 %v1991_v33 }
 0x1dc   :  { %2669 = vmatprep.subr.mxu0 %v1990_v46 }
 0x1dd   :  { %2670 = vmatpush3.msra.mxu0 %v1990_v46 }
 0x26e   :  { %v3443_v47 = vpop.f32.mrf.mxu0 }
 0x26f   :  { %v502_v27 = vadd.f32 %v3443_v47, %v1987_v61 }
 0x270   :  { %v3445_v48 = vpop.f32.mrf.mxu0 }
 0x271   :  { %v497_v31 = vadd.f32 %v1987_v61, %v3445_v48  ;;  %v576_v46 = vmax.f32 %v502_v27, 0.0 }
 0x272   :  { %v2568_v49 = vpop.f32.mrf.mxu0 }
 0x273   :  { %v512_v23 = vadd.f32 %v2568_v49, %v1987_v61  ;;  %v575_v49 = vmax.f32 %v497_v31, 0.0 }
 0x274   :  { %v506_v50 = vpop.f32.mrf.mxu0 }
 0x275   :  { %v507_v25 = vadd.f32 %v1987_v61, %v506_v50  ;;  %v578_v29 = vmax.f32 %v512_v23, 0.0 }
 0x276   :  { %v2571_v51 = vpop.f32.mrf.mxu0 }
 0x277   :  { %v522_v20 = vadd.f32 %v2571_v51, %v1987_v61  ;;  %v577_v33 = vmax.f32 %v507_v25, 0.0 }
 0x278   :  { %v516_v52 = vpop.f32.mrf.mxu0 }
 0x279   :  { %v517_v21 = vadd.f32 %v1987_v61, %v516_v52  ;;  %v580_v24 = vmax.f32 %v522_v20, 0.0 }
 0x27a   :  { %v2574_v53 = vpop.f32.mrf.mxu0 }
 0x27b   :  { %v532_v15 = vadd.f32 %v2574_v53, %v1987_v61  ;;  %v579_v26 = vmax.f32 %v517_v21, 0.0 }
 0x27c   :  { %v526_v54 = vpop.f32.mrf.mxu0 }
 0x27d   :  { %v527_v18 = vadd.f32 %v1987_v61, %v526_v54  ;;  %v582_v17 = vmax.f32 %v532_v15, 0.0 }
 0x27e   :  { %v2577_v55 = vpop.f32.mrf.mxu0 }
 0x27f   :  { %v542_v11 = vadd.f32 %v2577_v55, %v1987_v61  ;;  %v581_v22 = vmax.f32 %v527_v18, 0.0 }
 0x280   :  { %v536_v56 = vpop.f32.mrf.mxu0 }
 0x281   :  { %v537_v13 = vadd.f32 %v1987_v61, %v536_v56  ;;  %v584_v16 = vmax.f32 %v542_v11, 0.0 }
 0x282   :  { %v2580_v57 = vpop.f32.mrf.mxu0 }
 0x283   :  { %v552_v7 = vadd.f32 %v2580_v57, %v1987_v61  ;;  %v583_v19 = vmax.f32 %v537_v13, 0.0 }
 0x284   :  { %v546_v58 = vpop.f32.mrf.mxu0 }
 0x285   :  { %v547_v9 = vadd.f32 %v1987_v61, %v546_v58  ;;  %v586_v12 = vmax.f32 %v552_v7, 0.0 }
 0x286   :  { %v2583_v59 = vpop.f32.mrf.mxu0 }
 0x287   :  { %v562_v1 = vadd.f32 %v2583_v59, %v1987_v61  ;;  %v585_v14 = vmax.f32 %v547_v9, 0.0 }
 0x288   :  { %v556_v60 = vpop.f32.mrf.mxu0 }
 0x289   :  { %v557_v5 = vadd.f32 %v1987_v61, %v556_v60  ;;  %v588_v8 = vmax.f32 %v562_v1, 0.0  ;;  %v2007_v1 = vld [vmem:[%s3924_s4 + $0x88] sm:$0xff] }
 0x28a   :  { %v2586_v62 = vpop.f32.mrf.mxu0 }
 0x28b   :  { %v572_v63 = vadd.f32 %v2586_v62, %v1987_v61  ;;  %v587_v10 = vmax.f32 %v557_v5, 0.0 }
 0x28c   :  { %v566_v0 = vpop.f32.mrf.mxu0 }
 0x28d   :  { %v590_v2 = vmax.f32 %v572_v63, 0.0  ;;  %v567_v3 = vadd.f32 %v1987_v61, %v566_v0  ;;  %v2009_v63 = vld [vmem:[%s3924_s4 + $0x98] sm:$0xff]  ;;  %v2008_v0 = vld [vmem:[%s3924_s4 + $0x90] sm:$0xff] }
 0x28f   :  { %v589_v6 = vmax.f32 %v567_v3, 0.0  ;;  %2587 = vmatprep.subr.mxu1 %v590_v2 }
 0x290   :  { %2588 = vmatpush3.msra.mxu1 %v590_v2  ;;  %v2005_v2 = vld [vmem:[%s3925_s3 + $0x1] ss:$0 sm:$0xff] }
 0x291   :  { %2589 = vmatprep.subr.mxu1 %v589_v6 }
 0x292   :  { %2590 = vmatpush3.msra.mxu1 %v589_v6 }
 0x293   :  { %2591 = vmatprep.subr.mxu1 %v588_v8 }
 0x294   :  { %2592 = vmatpush3.msra.mxu1 %v588_v8 }
 0x295   :  { %2593 = vmatprep.subr.mxu1 %v587_v10 }
 0x296   :  { %2594 = vmatpush3.msra.mxu1 %v587_v10 }
 0x297   :  { %2595 = vmatprep.subr.mxu1 %v586_v12 }
 0x298   :  { %2596 = vmatpush3.msra.mxu1 %v586_v12 }
 0x299   :  { %2597 = vmatprep.subr.mxu1 %v585_v14 }
 0x29a   :  { %2598 = vmatpush3.msra.mxu1 %v585_v14 }
 0x29b   :  { %2599 = vmatprep.subr.mxu1 %v584_v16 }
 0x29c   :  { %2600 = vmatpush3.msra.mxu1 %v584_v16 }
 0x29d   :  { %2601 = vmatprep.subr.mxu1 %v583_v19 }
 0x29e   :  { %2602 = vmatpush3.msra.mxu1 %v583_v19 }
 0x29f   :  { %2603 = vmatprep.subr.mxu1 %v582_v17 }
 0x2a0   :  { %2604 = vmatpush3.msra.mxu1 %v582_v17 }
 0x2a1   :  { %2605 = vmatprep.subr.mxu1 %v581_v22 }
 0x2a2   :  { %2606 = vmatpush3.msra.mxu1 %v581_v22 }
 0x2a3   :  { %2607 = vmatprep.subr.mxu1 %v580_v24 }
 0x2a4   :  { %2608 = vmatpush3.msra.mxu1 %v580_v24 }
 0x2a5   :  { %2609 = vmatprep.subr.mxu1 %v579_v26 }
 0x2a6   :  { %2610 = vmatpush3.msra.mxu1 %v579_v26 }
 0x2a7   :  { %2611 = vmatprep.subr.mxu1 %v578_v29 }
 0x2a8   :  { %2612 = vmatpush3.msra.mxu1 %v578_v29 }
 0x2a9   :  { %2613 = vmatprep.subr.mxu1 %v577_v33 }
 0x2aa   :  { %2614 = vmatpush3.msra.mxu1 %v577_v33 }
 0x2ab   :  { %2615 = vmatprep.subr.mxu1 %v576_v46 }
 0x2ac   :  { %2616 = vmatpush3.msra.mxu1 %v576_v46 }
 0x2ad   :  { %2617 = vmatprep.subr.mxu1 %v575_v49 }
 0x2ae   :  { %2618 = vmatpush3.msra.mxu1 %v575_v49 }
 0x2af   :  { %2620 = vmatmul.mubr.f32.vlgmr.msra.gmra.mxu1 %v3247_v28  ;;  %v1989_v28 = vld [vmem:[%s3923_s2 + $0x88] sm:$0xff] }
 0x2b0   :  { %2622 = vmatprep.mubr.f32.mxu1 %v3255_v30  ;;  %2671 = vmatprep.subr.mxu0 %v1989_v28  ;;  %v1988_v30 = vld [vmem:[%s3923_s2 + $0x80] sm:$0xff] }
 0x2b1   :  { %2672 = vmatpush3.msra.mxu0 %v1989_v28 }
 0x2b2   :  { %2673 = vmatprep.subr.mxu0 %v1988_v30 }
 0x2b3   :  { %2623 = vmatmul.mubr.f32.gmra.mxu1 %v3265_v32  ;;  %2674 = vmatpush3.msra.mxu0 %v1988_v30  ;;  %v2021_v32 = vld [vmem:[%s3924_s4 + $0xf8] sm:$0xff] }
 0x2b4   :  { %2625 = vmatprep.mubr.f32.mxu1 %v3273_v34  ;;  %v2020_v34 = vld [vmem:[%s3924_s4 + $0xf0] sm:$0xff]  ;;  %2699 = vmatprep.subr.mxu1 %v2021_v32 }
 0x2b5   :  { %2700 = vmatpush3.msra.mxu1 %v2021_v32 }
 0x2b6   :  { %2701 = vmatprep.subr.mxu1 %v2020_v34 }
 0x2b7   :  { %2626 = vmatmul.mubr.f32.gmra.mxu1 %v3280_v35  ;;  %v2019_v35 = vld [vmem:[%s3924_s4 + $0xe8] sm:$0xff] }
 0x2b8   :  { %2628 = vmatprep.mubr.f32.mxu1 %v3285_v36  ;;  %2702 = vmatpush3.msra.mxu1 %v2020_v34  ;;  %v2018_v36 = vld [vmem:[%s3924_s4 + $0xe0] sm:$0xff] }
 0x2b9   :  { %2703 = vmatprep.subr.mxu1 %v2019_v35 }
 0x2ba   :  { %2704 = vmatpush3.msra.mxu1 %v2019_v35 }
 0x2bb   :  { %2629 = vmatmul.mubr.f32.gmra.mxu1 %v3292_v37  ;;  %v2017_v37 = vld [vmem:[%s3924_s4 + $0xd8] sm:$0xff]  ;;  %2705 = vmatprep.subr.mxu1 %v2018_v36 }
 0x2bc   :  { %2631 = vmatprep.mubr.f32.mxu1 %v3297_v38  ;;  %2706 = vmatpush3.msra.mxu1 %v2018_v36  ;;  %v2016_v38 = vld [vmem:[%s3924_s4 + $0xd0] sm:$0xff] }
 0x2bd   :  { %2707 = vmatprep.subr.mxu1 %v2017_v37 }
 0x2be   :  { %2708 = vmatpush3.msra.mxu1 %v2017_v37 }
 0x2bf   :  { %2632 = vmatmul.mubr.f32.gmra.mxu1 %v3304_v39  ;;  %v2015_v39 = vld [vmem:[%s3924_s4 + $0xc8] sm:$0xff]  ;;  %2709 = vmatprep.subr.mxu1 %v2016_v38 }
 0x2c0   :  { %2634 = vmatprep.mubr.f32.mxu1 %v3309_v40  ;;  %2710 = vmatpush3.msra.mxu1 %v2016_v38  ;;  %v2014_v40 = vld [vmem:[%s3924_s4 + $0xc0] sm:$0xff] }
 0x2c1   :  { %2711 = vmatprep.subr.mxu1 %v2015_v39 }
 0x2c2   :  { %2712 = vmatpush3.msra.mxu1 %v2015_v39 }
 0x2c3   :  { %2635 = vmatmul.mubr.f32.gmra.mxu1 %v3316_v41  ;;  %v2013_v41 = vld [vmem:[%s3924_s4 + $0xb8] sm:$0xff]  ;;  %2713 = vmatprep.subr.mxu1 %v2014_v40 }
 0x2c4   :  { %2637 = vmatprep.mubr.f32.mxu1 %v3321_v42  ;;  %2714 = vmatpush3.msra.mxu1 %v2014_v40  ;;  %v2012_v42 = vld [vmem:[%s3924_s4 + $0xb0] sm:$0xff] }
 0x2c5   :  { %2715 = vmatprep.subr.mxu1 %v2013_v41 }
 0x2c6   :  { %2716 = vmatpush3.msra.mxu1 %v2013_v41 }
 0x2c7   :  { %2638 = vmatmul.mubr.f32.gmra.mxu1 %v3328_v43  ;;  %v2011_v43 = vld [vmem:[%s3924_s4 + $0xa8] sm:$0xff]  ;;  %2717 = vmatprep.subr.mxu1 %v2012_v42 }
 0x2c8   :  { %2640 = vmatprep.mubr.f32.mxu1 %v3333_v44  ;;  %2718 = vmatpush3.msra.mxu1 %v2012_v42  ;;  %v2010_v44 = vld [vmem:[%s3924_s4 + $0xa0] sm:$0xff] }
 0x2c9   :  { %2719 = vmatprep.subr.mxu1 %v2011_v43 }
 0x2ca   :  { %2720 = vmatpush3.msra.mxu1 %v2011_v43 }
 0x2cb   :  { %2641 = vmatmul.mubr.f32.gmra.mxu1 %v3340_v45  ;;  %2721 = vmatprep.subr.mxu1 %v2010_v44 }
 0x2cc   :  { %2722 = vmatpush3.msra.mxu1 %v2010_v44 }
 0x2cd   :  { %2723 = vmatprep.subr.mxu1 %v2009_v63 }
 0x2ce   :  { %2724 = vmatpush3.msra.mxu1 %v2009_v63  ;;  %v2028_v63 = vld [vmem:[%s3923_s2 + $0x120] sm:$0xff] }
 0x2cf   :  { %2725 = vmatprep.subr.mxu1 %v2008_v0 }
 0x2d0   :  { %2726 = vmatpush3.msra.mxu1 %v2008_v0  ;;  %v2027_v0 = vld [vmem:[%s3923_s2 + $0x118] sm:$0xff] }
 0x2d1   :  { %2727 = vmatprep.subr.mxu1 %v2007_v1 }
 0x2d2   :  { %2728 = vmatpush3.msra.mxu1 %v2007_v1  ;;  %v2026_v1 = vld [vmem:[%s3923_s2 + $0x110] sm:$0xff] }
 0x36f   :  { %v2621_v45 = vpop.f32.mrf.mxu1 }
 0x371   :  { %v657_v47 = vpop.f32.mrf.mxu1 }
 0x372   :  { %2675 = vmatprep.mubr.f32.mxu0 %v657_v47 }
 0x373   :  { %v2624_v48 = vpop.f32.mrf.mxu1  ;;  %2676 = vmatmul.mubr.f32.vlgmr.msra.gmra.mxu0 %v2621_v45 }
 0x375   :  { %v667_v50 = vpop.f32.mrf.mxu1 }
 0x376   :  { %2678 = vmatprep.mubr.f32.mxu0 %v667_v50 }
 0x377   :  { %v2627_v51 = vpop.f32.mrf.mxu1  ;;  %2679 = vmatmul.mubr.f32.gmra.mxu0 %v2624_v48 }
 0x379   :  { %v677_v52 = vpop.f32.mrf.mxu1 }
 0x37a   :  { %2681 = vmatprep.mubr.f32.mxu0 %v677_v52  ;;  %v2039_v52 = vld [vmem:[%s3923_s2 + $0x178] sm:$0xff] }
 0x37b   :  { %v2630_v53 = vpop.f32.mrf.mxu1  ;;  %2682 = vmatmul.mubr.f32.gmra.mxu0 %v2627_v51 }
 0x37d   :  { %v687_v54 = vpop.f32.mrf.mxu1 }
 0x37e   :  { %2684 = vmatprep.mubr.f32.mxu0 %v687_v54  ;;  %v2037_v54 = vld [vmem:[%s3923_s2 + $0x168] sm:$0xff] }
 0x37f   :  { %v2633_v55 = vpop.f32.mrf.mxu1  ;;  %2685 = vmatmul.mubr.f32.gmra.mxu0 %v2630_v53  ;;  %v2038_v53 = vld [vmem:[%s3923_s2 + $0x170] sm:$0xff] }
 0x381   :  { %v697_v56 = vpop.f32.mrf.mxu1 }
 0x382   :  { %2687 = vmatprep.mubr.f32.mxu0 %v697_v56  ;;  %v2035_v56 = vld [vmem:[%s3923_s2 + $0x158] sm:$0xff] }
 0x383   :  { %v2636_v57 = vpop.f32.mrf.mxu1  ;;  %2688 = vmatmul.mubr.f32.gmra.mxu0 %v2633_v55  ;;  %v2036_v55 = vld [vmem:[%s3923_s2 + $0x160] sm:$0xff] }
 0x385   :  { %v707_v58 = vpop.f32.mrf.mxu1 }
 0x386   :  { %2690 = vmatprep.mubr.f32.mxu0 %v707_v58  ;;  %v2033_v58 = vld [vmem:[%s3923_s2 + $0x148] sm:$0xff] }
 0x387   :  { %v2639_v59 = vpop.f32.mrf.mxu1  ;;  %2691 = vmatmul.mubr.f32.gmra.mxu0 %v2636_v57  ;;  %v2034_v57 = vld [vmem:[%s3923_s2 + $0x150] sm:$0xff] }
 0x389   :  { %v717_v60 = vpop.f32.mrf.mxu1 }
 0x38a   :  { %2693 = vmatprep.mubr.f32.mxu0 %v717_v60  ;;  %v2031_v60 = vld [vmem:[%s3923_s2 + $0x138] sm:$0xff] }
 0x38b   :  { %v2642_v61 = vpop.f32.mrf.mxu1  ;;  %2694 = vmatmul.mubr.f32.gmra.mxu0 %v2639_v59  ;;  %v2032_v59 = vld [vmem:[%s3923_s2 + $0x140] sm:$0xff] }
 0x38d   :  { %v727_v62 = vpop.f32.mrf.mxu1 }
 0x38e   :  { %2696 = vmatprep.mubr.f32.mxu0 %v727_v62  ;;  %v2029_v62 = vld [vmem:[%s3923_s2 + $0x128] sm:$0xff] }
 0x38f   :  { %2697 = vmatmul.mubr.f32.gmra.mxu0 %v2642_v61  ;;  %v2030_v61 = vld [vmem:[%s3923_s2 + $0x130] sm:$0xff] }
 0x390   :  { %2787 = vmatprep.mubr.f32.mxu0 %v3172_v4  ;;  %v2006_v4 = vld [vmem:[%s3924_s4 + $0x80] sm:$0xff] }
 0x391   :  { %2729 = vmatprep.subr.mxu1 %v2006_v4 }
 0x392   :  { %2730 = vmatpush3.msra.mxu1 %v2006_v4 }
 0x393   :  { %2811 = vmatprep.subr.mxu1 %v2039_v52 }
 0x433   :  { %v2677_v3 = vpop.f32.mrf.mxu0 }
 0x434   :  { %v833_v5 = vadd.f32 %v2677_v3, %v2005_v2 }
 0x435   :  { %v827_v6 = vpop.f32.mrf.mxu0 }
 0x436   :  { %v828_v7 = vadd.f32 %v2005_v2, %v827_v6  ;;  %v907_v10 = vmax.f32 %v833_v5, 0.0 }
 0x437   :  { %v2680_v8 = vpop.f32.mrf.mxu0 }
 0x438   :  { %v906_v9 = vmax.f32 %v828_v7, 0.0  ;;  %v843_v11 = vadd.f32 %v2680_v8, %v2005_v2 }
 0x439   :  { %v837_v12 = vpop.f32.mrf.mxu0 }
 0x43a   :  { %v838_v13 = vadd.f32 %v2005_v2, %v837_v12  ;;  %2731 = vmatprep.mubr.f32.mxu1 %v906_v9  ;;  %v909_v16 = vmax.f32 %v843_v11, 0.0 }
 0x43b   :  { %v2683_v14 = vpop.f32.mrf.mxu0  ;;  %2732 = vmatmul.mubr.f32.vlgmr.msra.gmra.mxu1 %v907_v10 }
 0x43c   :  { %v908_v15 = vmax.f32 %v838_v13, 0.0  ;;  %v853_v18 = vadd.f32 %v2683_v14, %v2005_v2  ;;  %2812 = vmatpush3.msra.mxu1 %v2039_v52  ;;  %v3066_v52 = vld [vmem:[%s3922_s0 + $0x10] sm:$0xff] }
 0x43d   :  { %v847_v19 = vpop.f32.mrf.mxu0  ;;  %2813 = vmatprep.subr.mxu1 %v2038_v53 }
 0x43e   :  { %v848_v20 = vadd.f32 %v2005_v2, %v847_v19  ;;  %2734 = vmatprep.mubr.f32.mxu1 %v908_v15  ;;  %v911_v22 = vmax.f32 %v853_v18, 0.0  ;;  %2814 = vmatpush3.msra.mxu1 %v2038_v53  ;;  %v3067_v53 = vld [vmem:[%s3922_s0 + $0x18] sm:$0xff] }
 0x43f   :  { %v2686_v17 = vpop.f32.mrf.mxu0  ;;  %2735 = vmatmul.mubr.f32.gmra.mxu1 %v909_v16  ;;  %2815 = vmatprep.subr.mxu1 %v2037_v54  ;;  %v2023_v16 = vld [vmem:[%s3926_s5 + $0x1] ss:$0 sm:$0xff] }
 0x440   :  { %v910_v21 = vmax.f32 %v848_v20, 0.0  ;;  %v863_v23 = vadd.f32 %v2686_v17, %v2005_v2  ;;  %2816 = vmatpush3.msra.mxu1 %v2037_v54  ;;  %v3068_v54 = vld [vmem:[%s3922_s0 + $0x20] sm:$0xff] }
 0x441   :  { %v857_v24 = vpop.f32.mrf.mxu0  ;;  %2817 = vmatprep.subr.mxu1 %v2036_v55 }
 0x442   :  { %v858_v25 = vadd.f32 %v2005_v2, %v857_v24  ;;  %2737 = vmatprep.mubr.f32.mxu1 %v910_v21  ;;  %v913_v29 = vmax.f32 %v863_v23, 0.0  ;;  %2818 = vmatpush3.msra.mxu1 %v2036_v55  ;;  %v3069_v55 = vld [vmem:[%s3922_s0 + $0x28] sm:$0xff] }
 0x443   :  { %v2689_v26 = vpop.f32.mrf.mxu0  ;;  %2738 = vmatmul.mubr.f32.gmra.mxu1 %v911_v22  ;;  %2819 = vmatprep.subr.mxu1 %v2035_v56 }
 0x444   :  { %v912_v27 = vmax.f32 %v858_v25, 0.0  ;;  %v873_v31 = vadd.f32 %v2689_v26, %v2005_v2  ;;  %2820 = vmatpush3.msra.mxu1 %v2035_v56  ;;  %v3070_v56 = vld [vmem:[%s3922_s0 + $0x30] sm:$0xff] }
 0x445   :  { %v867_v33 = vpop.f32.mrf.mxu0  ;;  %2821 = vmatprep.subr.mxu1 %v2034_v57 }
 0x446   :  { %v868_v46 = vadd.f32 %v2005_v2, %v867_v33  ;;  %2740 = vmatprep.mubr.f32.mxu1 %v912_v27  ;;  %v915_v30 = vmax.f32 %v873_v31, 0.0  ;;  %2822 = vmatpush3.msra.mxu1 %v2034_v57  ;;  %v3071_v57 = vld [vmem:[%s3922_s0 + $0x38] sm:$0xff] }
 0x447   :  { %v2692_v49 = vpop.f32.mrf.mxu0  ;;  %2741 = vmatmul.mubr.f32.gmra.mxu1 %v913_v29  ;;  %2823 = vmatprep.subr.mxu1 %v2033_v58 }
 0x448   :  { %v914_v28 = vmax.f32 %v868_v46, 0.0  ;;  %v883_v32 = vadd.f32 %v2692_v49, %v2005_v2  ;;  %2824 = vmatpush3.msra.mxu1 %v2033_v58  ;;  %v3072_v58 = vld [vmem:[%s3922_s0 + $0x40] sm:$0xff] }
 0x449   :  { %v877_v34 = vpop.f32.mrf.mxu0  ;;  %2825 = vmatprep.subr.mxu1 %v2032_v59 }
 0x44a   :  { %v878_v35 = vadd.f32 %v2005_v2, %v877_v34  ;;  %2743 = vmatprep.mubr.f32.mxu1 %v914_v28  ;;  %v917_v38 = vmax.f32 %v883_v32, 0.0  ;;  %2826 = vmatpush3.msra.mxu1 %v2032_v59  ;;  %v3073_v59 = vld [vmem:[%s3922_s0 + $0x48] sm:$0xff] }
 0x44b   :  { %v2695_v36 = vpop.f32.mrf.mxu0  ;;  %2744 = vmatmul.mubr.f32.gmra.mxu1 %v915_v30  ;;  %2827 = vmatprep.subr.mxu1 %v2031_v60 }
 0x44c   :  { %v916_v37 = vmax.f32 %v878_v35, 0.0  ;;  %v893_v39 = vadd.f32 %v2695_v36, %v2005_v2  ;;  %2828 = vmatpush3.msra.mxu1 %v2031_v60  ;;  %v3074_v60 = vld [vmem:[%s3922_s0 + $0x50] sm:$0xff] }
 0x44d   :  { %v887_v40 = vpop.f32.mrf.mxu0  ;;  %2829 = vmatprep.subr.mxu1 %v2030_v61 }
 0x44e   :  { %v888_v41 = vadd.f32 %v2005_v2, %v887_v40  ;;  %2746 = vmatprep.mubr.f32.mxu1 %v916_v37  ;;  %v919_v44 = vmax.f32 %v893_v39, 0.0  ;;  %2830 = vmatpush3.msra.mxu1 %v2030_v61  ;;  %v3075_v61 = vld [vmem:[%s3922_s0 + $0x58] sm:$0xff] }
 0x44f   :  { %v2698_v42 = vpop.f32.mrf.mxu0  ;;  %2747 = vmatmul.mubr.f32.gmra.mxu1 %v917_v38  ;;  %2831 = vmatprep.subr.mxu1 %v2029_v62 }
 0x450   :  { %v918_v43 = vmax.f32 %v888_v41, 0.0  ;;  %v903_v45 = vadd.f32 %v2698_v42, %v2005_v2  ;;  %2832 = vmatpush3.msra.mxu1 %v2029_v62  ;;  %v3076_v62 = vld [vmem:[%s3922_s0 + $0x60] sm:$0xff] }
 0x451   :  { %v897_v47 = vpop.f32.mrf.mxu0  ;;  %2833 = vmatprep.subr.mxu1 %v2028_v63 }
 0x452   :  { %v898_v48 = vadd.f32 %v2005_v2, %v897_v47  ;;  %2749 = vmatprep.mubr.f32.mxu1 %v918_v43  ;;  %v921_v51 = vmax.f32 %v903_v45, 0.0  ;;  %2834 = vmatpush3.msra.mxu1 %v2028_v63  ;;  %v3077_v63 = vld [vmem:[%s3922_s0 + $0x68] sm:$0xff] }
 0x453   :  { %2750 = vmatmul.mubr.f32.gmra.mxu1 %v919_v44  ;;  %2835 = vmatprep.subr.mxu1 %v2027_v0 }
 0x454   :  { %v920_v50 = vmax.f32 %v898_v48, 0.0  ;;  %2836 = vmatpush3.msra.mxu1 %v2027_v0  ;;  %v3078_v0 = vld [vmem:[%s3922_s0 + $0x70] sm:$0xff] }
 0x455   :  { %2837 = vmatprep.subr.mxu1 %v2026_v1 }
 0x456   :  { %2752 = vmatprep.mubr.f32.mxu1 %v920_v50  ;;  %2838 = vmatpush3.msra.mxu1 %v2026_v1  ;;  %v3079_v1 = vld [vmem:[%s3922_s0 + $0x78] sm:$0xff] }
 0x457   :  { %2753 = vmatmul.mubr.f32.gmra.mxu1 %v921_v51  ;;  %v3065_v51 = vld [vmem:[%s3922_s0 + $0x8] sm:$0xff] }
 0x4fb   :  { %v3567_v4 = vpop.f32.mrf.mxu1 }
 0x4fc   :  { %v1019_v43 = vadd.f32 %v3567_v4, %v2023_v16  ;;  %v2025_v4 = vld [vmem:[%s3923_s2 + $0x108] sm:$0xff] }
 0x4fd   :  { %v3569_v2 = vpop.f32.mrf.mxu1  ;;  %2839 = vmatprep.subr.mxu1 %v2025_v4 }
 0x4fe   :  { %v1014_v45 = vadd.f32 %v2023_v16, %v3569_v2  ;;  %v1093_v48 = vmax.f32 %v1019_v43, 0.0  ;;  %2840 = vmatpush3.msra.mxu1 %v2025_v4  ;;  %v2024_v2 = vld [vmem:[%s3923_s2 + $0x100] sm:$0xff] }
 0x4ff   :  { %v2736_v3 = vpop.f32.mrf.mxu1  ;;  %2841 = vmatprep.subr.mxu1 %v2024_v2 }
 0x500   :  { %v1029_v39 = vadd.f32 %v2736_v3, %v2023_v16  ;;  %v1092_v50 = vmax.f32 %v1014_v45, 0.0  ;;  %2842 = vmatpush3.msra.mxu1 %v2024_v2  ;;  %v2057_v3 = vld [vmem:[%s3924_s4 + $0x178] sm:$0xff] }
 0x501   :  { %v1023_v5 = vpop.f32.mrf.mxu1 }
 0x502   :  { %v1024_v41 = vadd.f32 %v2023_v16, %v1023_v5  ;;  %v1095_v44 = vmax.f32 %v1029_v39, 0.0  ;;  %v2056_v5 = vld [vmem:[%s3924_s4 + $0x170] sm:$0xff] }
 0x503   :  { %v2739_v6 = vpop.f32.mrf.mxu1 }
 0x504   :  { %v1039_v35 = vadd.f32 %v2739_v6, %v2023_v16  ;;  %v1094_v47 = vmax.f32 %v1024_v41, 0.0  ;;  %v2055_v6 = vld [vmem:[%s3924_s4 + $0x168] sm:$0xff] }
 0x505   :  { %v1033_v7 = vpop.f32.mrf.mxu1 }
 0x506   :  { %v1034_v37 = vadd.f32 %v2023_v16, %v1033_v7  ;;  %v1097_v40 = vmax.f32 %v1039_v35, 0.0  ;;  %v2054_v7 = vld [vmem:[%s3924_s4 + $0x160] sm:$0xff] }
 0x507   :  { %v2742_v8 = vpop.f32.mrf.mxu1 }
 0x508   :  { %v1049_v28 = vadd.f32 %v2742_v8, %v2023_v16  ;;  %v1096_v42 = vmax.f32 %v1034_v37, 0.0  ;;  %v2053_v8 = vld [vmem:[%s3924_s4 + $0x158] sm:$0xff] }
 0x509   :  { %v1043_v9 = vpop.f32.mrf.mxu1 }
 0x50a   :  { %v1044_v32 = vadd.f32 %v2023_v16, %v1043_v9  ;;  %v1099_v36 = vmax.f32 %v1049_v28, 0.0  ;;  %v2052_v9 = vld [vmem:[%s3924_s4 + $0x150] sm:$0xff] }
 0x50b   :  { %v2745_v10 = vpop.f32.mrf.mxu1  ;;  %v2044_v28 = vld [vmem:[%s3924_s4 + $0x110] sm:$0xff] }
 0x50c   :  { %v1059_v31 = vadd.f32 %v2745_v10, %v2023_v16  ;;  %v1098_v38 = vmax.f32 %v1044_v32, 0.0  ;;  %v2051_v10 = vld [vmem:[%s3924_s4 + $0x148] sm:$0xff]  ;;  %v2042_v32 = vld [vmem:[%s3924_s4 + $0x100] sm:$0xff] }
 0x50d   :  { %v1053_v11 = vpop.f32.mrf.mxu1 }
 0x50e   :  { %v1054_v46 = vadd.f32 %v2023_v16, %v1053_v11  ;;  %v1101_v30 = vmax.f32 %v1059_v31, 0.0  ;;  %v2050_v11 = vld [vmem:[%s3924_s4 + $0x140] sm:$0xff] }
 0x50f   :  { %v2748_v12 = vpop.f32.mrf.mxu1 }
 0x510   :  { %v1069_v25 = vadd.f32 %v2748_v12, %v2023_v16  ;;  %v1100_v34 = vmax.f32 %v1054_v46, 0.0  ;;  %v2049_v12 = vld [vmem:[%s3924_s4 + $0x138] sm:$0xff] }
 0x511   :  { %v1063_v13 = vpop.f32.mrf.mxu1 }
 0x512   :  { %v1064_v27 = vadd.f32 %v2023_v16, %v1063_v13  ;;  %v1103_v33 = vmax.f32 %v1069_v25, 0.0  ;;  %v2048_v13 = vld [vmem:[%s3924_s4 + $0x130] sm:$0xff] }
 0x513   :  { %v2751_v14 = vpop.f32.mrf.mxu1 }
 0x514   :  { %v1079_v17 = vadd.f32 %v2751_v14, %v2023_v16  ;;  %v1102_v49 = vmax.f32 %v1064_v27, 0.0  ;;  %v2047_v14 = vld [vmem:[%s3924_s4 + $0x128] sm:$0xff] }
 0x515   :  { %v1073_v15 = vpop.f32.mrf.mxu1 }
 0x516   :  { %v1074_v23 = vadd.f32 %v2023_v16, %v1073_v15  ;;  %v1105_v26 = vmax.f32 %v1079_v17, 0.0  ;;  %v2046_v15 = vld [vmem:[%s3924_s4 + $0x120] sm:$0xff] }
 0x517   :  { %v2754_v18 = vpop.f32.mrf.mxu1 }
 0x518   :  { %v1089_v19 = vadd.f32 %v2754_v18, %v2023_v16  ;;  %v1104_v29 = vmax.f32 %v1074_v23, 0.0 }
 0x519   :  { %v1083_v20 = vpop.f32.mrf.mxu1 }
 0x51a   :  { %v1107_v21 = vmax.f32 %v1089_v19, 0.0  ;;  %v1084_v22 = vadd.f32 %v2023_v16, %v1083_v20 }
 0x51c   :  { %v1106_v24 = vmax.f32 %v1084_v22, 0.0  ;;  %2755 = vmatprep.subr.mxu0 %v1107_v21 }
 0x51d   :  { %2756 = vmatpush3.msra.mxu0 %v1107_v21 }
 0x51e   :  { %2757 = vmatprep.subr.mxu0 %v1106_v24 }
 0x51f   :  { %2758 = vmatpush3.msra.mxu0 %v1106_v24 }
 0x520   :  { %2759 = vmatprep.subr.mxu0 %v1105_v26 }
 0x521   :  { %2760 = vmatpush3.msra.mxu0 %v1105_v26 }
 0x522   :  { %2761 = vmatprep.subr.mxu0 %v1104_v29 }
 0x523   :  { %2762 = vmatpush3.msra.mxu0 %v1104_v29 }
 0x524   :  { %2763 = vmatprep.subr.mxu0 %v1103_v33 }
 0x525   :  { %2764 = vmatpush3.msra.mxu0 %v1103_v33 }
 0x526   :  { %2765 = vmatprep.subr.mxu0 %v1102_v49 }
 0x527   :  { %2766 = vmatpush3.msra.mxu0 %v1102_v49  ;;  %v2045_v49 = vld [vmem:[%s3924_s4 + $0x118] sm:$0xff] }
 0x528   :  { %2767 = vmatprep.subr.mxu0 %v1101_v30 }
 0x529   :  { %2768 = vmatpush3.msra.mxu0 %v1101_v30  ;;  %v2043_v30 = vld [vmem:[%s3924_s4 + $0x108] sm:$0xff] }
 0x52a   :  { %2769 = vmatprep.subr.mxu0 %v1100_v34 }
 0x52b   :  { %2770 = vmatpush3.msra.mxu0 %v1100_v34  ;;  %v2041_v34 = vld [vmem:[%s3925_s3 + $0x2] ss:$0 sm:$0xff] }
 0x52c   :  { %2771 = vmatprep.subr.mxu0 %v1099_v36 }
 0x52d   :  { %2772 = vmatpush3.msra.mxu0 %v1099_v36 }
 0x52e   :  { %2773 = vmatprep.subr.mxu0 %v1098_v38 }
 0x52f   :  { %2774 = vmatpush3.msra.mxu0 %v1098_v38 }
 0x530   :  { %2775 = vmatprep.subr.mxu0 %v1097_v40 }
 0x531   :  { %2776 = vmatpush3.msra.mxu0 %v1097_v40 }
 0x532   :  { %2777 = vmatprep.subr.mxu0 %v1096_v42 }
 0x533   :  { %2778 = vmatpush3.msra.mxu0 %v1096_v42 }
 0x534   :  { %2779 = vmatprep.subr.mxu0 %v1095_v44 }
 0x535   :  { %2780 = vmatpush3.msra.mxu0 %v1095_v44 }
 0x536   :  { %2781 = vmatprep.subr.mxu0 %v1094_v47 }
 0x537   :  { %2782 = vmatpush3.msra.mxu0 %v1094_v47 }
 0x538   :  { %2783 = vmatprep.subr.mxu0 %v1093_v48 }
 0x539   :  { %2784 = vmatpush3.msra.mxu0 %v1093_v48 }
 0x53a   :  { %2785 = vmatprep.subr.mxu0 %v1092_v50 }
 0x53b   :  { %2786 = vmatpush3.msra.mxu0 %v1092_v50 }
 0x53c   :  { %2788 = vmatmul.mubr.f32.vlgmr.msra.gmra.mxu0 %v3065_v51  ;;  %2867 = vmatprep.subr.mxu0 %v2057_v3 }
 0x53d   :  { %2790 = vmatprep.mubr.f32.mxu0 %v3066_v52  ;;  %2868 = vmatpush3.msra.mxu0 %v2057_v3 }
 0x53e   :  { %2869 = vmatprep.subr.mxu0 %v2056_v5 }
 0x53f   :  { %2870 = vmatpush3.msra.mxu0 %v2056_v5 }
 0x540   :  { %2791 = vmatmul.mubr.f32.gmra.mxu0 %v3067_v53  ;;  %2871 = vmatprep.subr.mxu0 %v2055_v6 }
 0x541   :  { %2793 = vmatprep.mubr.f32.mxu0 %v3068_v54  ;;  %2872 = vmatpush3.msra.mxu0 %v2055_v6 }
 0x542   :  { %2873 = vmatprep.subr.mxu0 %v2054_v7 }
 0x543   :  { %2874 = vmatpush3.msra.mxu0 %v2054_v7 }
 0x544   :  { %2794 = vmatmul.mubr.f32.gmra.mxu0 %v3069_v55  ;;  %2875 = vmatprep.subr.mxu0 %v2053_v8 }
 0x545   :  { %2796 = vmatprep.mubr.f32.mxu0 %v3070_v56  ;;  %2876 = vmatpush3.msra.mxu0 %v2053_v8 }
 0x546   :  { %2877 = vmatprep.subr.mxu0 %v2052_v9 }
 0x547   :  { %2878 = vmatpush3.msra.mxu0 %v2052_v9 }
 0x548   :  { %2797 = vmatmul.mubr.f32.gmra.mxu0 %v3071_v57  ;;  %2879 = vmatprep.subr.mxu0 %v2051_v10 }
 0x549   :  { %2799 = vmatprep.mubr.f32.mxu0 %v3072_v58  ;;  %2880 = vmatpush3.msra.mxu0 %v2051_v10 }
 0x54a   :  { %2881 = vmatprep.subr.mxu0 %v2050_v11 }
 0x54b   :  { %2882 = vmatpush3.msra.mxu0 %v2050_v11 }
 0x54c   :  { %2800 = vmatmul.mubr.f32.gmra.mxu0 %v3073_v59  ;;  %2883 = vmatprep.subr.mxu0 %v2049_v12 }
 0x54d   :  { %2802 = vmatprep.mubr.f32.mxu0 %v3074_v60  ;;  %2884 = vmatpush3.msra.mxu0 %v2049_v12 }
 0x54e   :  { %2885 = vmatprep.subr.mxu0 %v2048_v13 }
 0x54f   :  { %2886 = vmatpush3.msra.mxu0 %v2048_v13 }
 0x550   :  { %2803 = vmatmul.mubr.f32.gmra.mxu0 %v3075_v61  ;;  %2887 = vmatprep.subr.mxu0 %v2047_v14 }
 0x551   :  { %2805 = vmatprep.mubr.f32.mxu0 %v3076_v62  ;;  %2888 = vmatpush3.msra.mxu0 %v2047_v14 }
 0x552   :  { %2889 = vmatprep.subr.mxu0 %v2046_v15 }
 0x553   :  { %2890 = vmatpush3.msra.mxu0 %v2046_v15 }
 0x554   :  { %2806 = vmatmul.mubr.f32.gmra.mxu0 %v3077_v63  ;;  %2891 = vmatprep.subr.mxu0 %v2045_v49 }
 0x555   :  { %2808 = vmatprep.mubr.f32.mxu0 %v3078_v0  ;;  %2892 = vmatpush3.msra.mxu0 %v2045_v49  ;;  %v1701_v49 = vld [vmem:[%s3927_s7 + $0x28] sm:$0xff] }
 0x556   :  { %2893 = vmatprep.subr.mxu0 %v2044_v28 }
 0x557   :  { %2894 = vmatpush3.msra.mxu0 %v2044_v28  ;;  %v1700_v28 = vld [vmem:[%s3927_s7 + $0x20] sm:$0xff] }
 0x558   :  { %2809 = vmatmul.mubr.f32.gmra.mxu0 %v3079_v1  ;;  %2895 = vmatprep.subr.mxu0 %v2043_v30 }
 0x559   :  { %2896 = vmatpush3.msra.mxu0 %v2043_v30  ;;  %v1699_v30 = vld [vmem:[%s3927_s7 + $0x18] sm:$0xff] }
 0x55a   :  { %2897 = vmatprep.subr.mxu0 %v2042_v32 }
 0x55b   :  { %2898 = vmatpush3.msra.mxu0 %v2042_v32  ;;  %v1698_v32 = vld [vmem:[%s3927_s7 + $0x10] sm:$0xff] }
 0x5fc   :  { %v2789_v16 = vpop.f32.mrf.mxu0 }
 0x5fe   :  { %v1174_v18 = vpop.f32.mrf.mxu0 }
 0x5ff   :  { %2843 = vmatprep.mubr.f32.mxu1 %v1174_v18 }
 0x600   :  { %v2792_v19 = vpop.f32.mrf.mxu0  ;;  %2844 = vmatmul.mubr.f32.vlgmr.msra.gmra.mxu1 %v2789_v16 }
 0x602   :  { %v1184_v20 = vpop.f32.mrf.mxu0 }
 0x603   :  { %2846 = vmatprep.mubr.f32.mxu1 %v1184_v20 }
 0x604   :  { %v2795_v17 = vpop.f32.mrf.mxu0  ;;  %2847 = vmatmul.mubr.f32.gmra.mxu1 %v2792_v19 }
 0x606   :  { %v1194_v21 = vpop.f32.mrf.mxu0 }
 0x607   :  { %2849 = vmatprep.mubr.f32.mxu1 %v1194_v21  ;;  %v3080_v21 = vmov 0.0  }
 0x608   :  { %v2798_v22 = vpop.f32.mrf.mxu0  ;;  %2850 = vmatmul.mubr.f32.gmra.mxu1 %v2795_v17  ;;  %2923 = vmatprep.subr.mxu1 %v3080_v21 }
 0x609   :  { %2958 = vmatprep.subr.mxu0 %v3080_v21 }
 0x60a   :  { %v1204_v23 = vpop.f32.mrf.mxu0 }
 0x60b   :  { %2852 = vmatprep.mubr.f32.mxu1 %v1204_v23  ;;  %v1710_v23 = vld [vmem:[%s3927_s7 + $0x70] sm:$0xff] }
 0x60c   :  { %v2801_v24 = vpop.f32.mrf.mxu0  ;;  %2853 = vmatmul.mubr.f32.gmra.mxu1 %v2798_v22  ;;  %v1711_v22 = vld [vmem:[%s3927_s7 + $0x78] sm:$0xff] }
 0x60e   :  { %v1214_v25 = vpop.f32.mrf.mxu0 }
 0x60f   :  { %2855 = vmatprep.mubr.f32.mxu1 %v1214_v25  ;;  %v1708_v25 = vld [vmem:[%s3927_s7 + $0x60] sm:$0xff] }
 0x610   :  { %v2804_v26 = vpop.f32.mrf.mxu0  ;;  %2856 = vmatmul.mubr.f32.gmra.mxu1 %v2801_v24  ;;  %v1709_v24 = vld [vmem:[%s3927_s7 + $0x68] sm:$0xff] }
 0x612   :  { %v1224_v27 = vpop.f32.mrf.mxu0 }
 0x613   :  { %2858 = vmatprep.mubr.f32.mxu1 %v1224_v27  ;;  %v1706_v27 = vld [vmem:[%s3927_s7 + $0x50] sm:$0xff] }
 0x614   :  { %v2807_v29 = vpop.f32.mrf.mxu0  ;;  %2859 = vmatmul.mubr.f32.gmra.mxu1 %v2804_v26  ;;  %v1707_v26 = vld [vmem:[%s3927_s7 + $0x58] sm:$0xff] }
 0x616   :  { %v1234_v31 = vpop.f32.mrf.mxu0 }
 0x617   :  { %2861 = vmatprep.mubr.f32.mxu1 %v1234_v31  ;;  %v1704_v31 = vld [vmem:[%s3927_s7 + $0x40] sm:$0xff] }
 0x618   :  { %v2810_v33 = vpop.f32.mrf.mxu0  ;;  %2862 = vmatmul.mubr.f32.gmra.mxu1 %v2807_v29  ;;  %v1705_v29 = vld [vmem:[%s3927_s7 + $0x48] sm:$0xff] }
 0x61a   :  { %v1244_v46 = vpop.f32.mrf.mxu0 }
 0x61b   :  { %2864 = vmatprep.mubr.f32.mxu1 %v1244_v46  ;;  %v1702_v46 = vld [vmem:[%s3927_s7 + $0x30] sm:$0xff] }
 0x61c   :  { %2865 = vmatmul.mubr.f32.gmra.mxu1 %v2810_v33  ;;  %v1703_v33 = vld [vmem:[%s3927_s7 + $0x38] sm:$0xff] }
 0x61d   :  { %2955 = vmatprep.mubr.msk.f32.mxu1 %vm3081_vm0, %v3080_v21 }
 0x6c0   :  { %v2845_v35 = vpop.f32.mrf.mxu1 }
 0x6c1   :  { %v1350_v36 = vadd.f32 %v2845_v35, %v2041_v34  ;;  %v1696_v35 = vld [vmem:[%s3927_s7] sm:$0xff] }
 0x6c2   :  { %v1344_v37 = vpop.f32.mrf.mxu1 }
 0x6c3   :  { %v1345_v38 = vadd.f32 %v2041_v34, %v1344_v37  ;;  %v1424_v41 = vmax.f32 %v1350_v36, 0.0 }
 0x6c4   :  { %v2848_v39 = vpop.f32.mrf.mxu1 }
 0x6c5   :  { %v1423_v40 = vmax.f32 %v1345_v38, 0.0  ;;  %v1360_v42 = vadd.f32 %v2848_v39, %v2041_v34 }
 0x6c6   :  { %v1354_v43 = vpop.f32.mrf.mxu1 }
 0x6c7   :  { %v1355_v44 = vadd.f32 %v2041_v34, %v1354_v43  ;;  %2899 = vmatprep.mubr.f32.mxu0 %v1423_v40  ;;  %v1426_v48 = vmax.f32 %v1360_v42, 0.0 }
 0x6c8   :  { %v2851_v45 = vpop.f32.mrf.mxu1  ;;  %2900 = vmatmul.mubr.f32.vlgmr.msra.gmra.mxu0 %v1424_v41 }
 0x6c9   :  { %v1425_v47 = vmax.f32 %v1355_v44, 0.0  ;;  %v1370_v50 = vadd.f32 %v2851_v45, %v2041_v34  ;;  %2959 = vmatpush3.msra.mxu0 %v1711_v22 }
 0x6ca   :  { %v1364_v51 = vpop.f32.mrf.mxu1  ;;  %2960 = vmatprep.subr.mxu0 %v3080_v21 }
 0x6cb   :  { %v1365_v52 = vadd.f32 %v2041_v34, %v1364_v51  ;;  %2902 = vmatprep.mubr.f32.mxu0 %v1425_v47  ;;  %v1428_v55 = vmax.f32 %v1370_v50, 0.0  ;;  %2961 = vmatpush3.msra.mxu0 %v1710_v23 }
 0x6cc   :  { %v2854_v53 = vpop.f32.mrf.mxu1  ;;  %2903 = vmatmul.mubr.f32.gmra.mxu0 %v1426_v48  ;;  %2962 = vmatprep.subr.mxu0 %v3080_v21 }
 0x6cd   :  { %v1427_v54 = vmax.f32 %v1365_v52, 0.0  ;;  %v1380_v56 = vadd.f32 %v2854_v53, %v2041_v34  ;;  %2963 = vmatpush3.msra.mxu0 %v1709_v24  ;;  %v2059_v52 = vld [vmem:[%s3926_s5 + $0x2] ss:$0 sm:$0xff] }
 0x6ce   :  { %v1374_v57 = vpop.f32.mrf.mxu1  ;;  %2964 = vmatprep.subr.mxu0 %v3080_v21  ;;  %v1625_v24 = vld [vmem:[%s3928_s6] sm:$0xff] }
 0x6cf   :  { %v1375_v58 = vadd.f32 %v2041_v34, %v1374_v57  ;;  %2905 = vmatprep.mubr.f32.mxu0 %v1427_v54  ;;  %v1430_v61 = vmax.f32 %v1380_v56, 0.0  ;;  %2965 = vmatpush3.msra.mxu0 %v1708_v25  ;;  %v1805_v25 = vld [vmem:[%s3929_s9 + $0x78] sm:$0xff] }
 0x6d0   :  { %v2857_v59 = vpop.f32.mrf.mxu1  ;;  %2906 = vmatmul.mubr.f32.gmra.mxu0 %v1428_v55  ;;  %2966 = vmatprep.subr.mxu0 %v3080_v21 }
 0x6d1   :  { %v1429_v60 = vmax.f32 %v1375_v58, 0.0  ;;  %v1390_v62 = vadd.f32 %v2857_v59, %v2041_v34  ;;  %2967 = vmatpush3.msra.mxu0 %v1707_v26  ;;  %v1804_v26 = vld [vmem:[%s3929_s9 + $0x70] sm:$0xff] }
 0x6d2   :  { %v1384_v63 = vpop.f32.mrf.mxu1  ;;  %2968 = vmatprep.subr.mxu0 %v3080_v21 }
 0x6d3   :  { %v1385_v0 = vadd.f32 %v2041_v34, %v1384_v63  ;;  %2908 = vmatprep.mubr.f32.mxu0 %v1429_v60  ;;  %v1432_v2 = vmax.f32 %v1390_v62, 0.0  ;;  %2969 = vmatpush3.msra.mxu0 %v1706_v27  ;;  %v1803_v27 = vld [vmem:[%s3929_s9 + $0x68] sm:$0xff] }
 0x6d4   :  { %v2860_v1 = vpop.f32.mrf.mxu1  ;;  %2909 = vmatmul.mubr.f32.gmra.mxu0 %v1430_v61  ;;  %2970 = vmatprep.subr.mxu0 %v3080_v21 }
 0x6d5   :  { %v1431_v4 = vmax.f32 %v1385_v0, 0.0  ;;  %v1400_v3 = vadd.f32 %v2860_v1, %v2041_v34  ;;  %2971 = vmatpush3.msra.mxu0 %v1705_v29  ;;  %v1802_v29 = vld [vmem:[%s3929_s9 + $0x60] sm:$0xff] }
 0x6d6   :  { %v1394_v5 = vpop.f32.mrf.mxu1  ;;  %2972 = vmatprep.subr.mxu0 %v3080_v21 }
 0x6d7   :  { %v1395_v6 = vadd.f32 %v2041_v34, %v1394_v5  ;;  %2911 = vmatprep.mubr.f32.mxu0 %v1431_v4  ;;  %v1434_v9 = vmax.f32 %v1400_v3, 0.0  ;;  %2973 = vmatpush3.msra.mxu0 %v1704_v31  ;;  %v1801_v31 = vld [vmem:[%s3929_s9 + $0x58] sm:$0xff] }
 0x6d8   :  { %v2863_v7 = vpop.f32.mrf.mxu1  ;;  %2912 = vmatmul.mubr.f32.gmra.mxu0 %v1432_v2  ;;  %2974 = vmatprep.subr.mxu0 %v3080_v21 }
 0x6d9   :  { %v1433_v8 = vmax.f32 %v1395_v6, 0.0  ;;  %v1410_v10 = vadd.f32 %v2863_v7, %v2041_v34  ;;  %2975 = vmatpush3.msra.mxu0 %v1703_v33  ;;  %v1800_v33 = vld [vmem:[%s3929_s9 + $0x50] sm:$0xff] }
 0x6da   :  { %v1404_v11 = vpop.f32.mrf.mxu1  ;;  %2976 = vmatprep.subr.mxu0 %v3080_v21 }
 0x6db   :  { %v1405_v12 = vadd.f32 %v2041_v34, %v1404_v11  ;;  %2914 = vmatprep.mubr.f32.mxu0 %v1433_v8  ;;  %v1436_v15 = vmax.f32 %v1410_v10, 0.0  ;;  %2977 = vmatpush3.msra.mxu0 %v1702_v46  ;;  %v1799_v46 = vld [vmem:[%s3929_s9 + $0x48] sm:$0xff] }
 0x6dc   :  { %v2866_v13 = vpop.f32.mrf.mxu1  ;;  %2915 = vmatmul.mubr.f32.gmra.mxu0 %v1434_v9  ;;  %2978 = vmatprep.subr.mxu0 %v3080_v21 }
 0x6dd   :  { %v1435_v14 = vmax.f32 %v1405_v12, 0.0  ;;  %v1420_v16 = vadd.f32 %v2866_v13, %v2041_v34  ;;  %2979 = vmatpush3.msra.mxu0 %v1701_v49  ;;  %v1798_v49 = vld [vmem:[%s3929_s9 + $0x40] sm:$0xff] }
 0x6de   :  { %v1414_v18 = vpop.f32.mrf.mxu1  ;;  %2980 = vmatprep.subr.mxu0 %v3080_v21 }
 0x6df   :  { %v1415_v19 = vadd.f32 %v2041_v34, %v1414_v18  ;;  %2917 = vmatprep.mubr.f32.mxu0 %v1435_v14  ;;  %v1438_v17 = vmax.f32 %v1420_v16, 0.0  ;;  %2981 = vmatpush3.msra.mxu0 %v1700_v28  ;;  %v1697_v34 = vld [vmem:[%s3927_s7 + $0x8] sm:$0xff]  ;;  %v1797_v28 = vld [vmem:[%s3929_s9 + $0x38] sm:$0xff] }
 0x6e0   :  { %2918 = vmatmul.mubr.f32.gmra.mxu0 %v1436_v15  ;;  %2982 = vmatprep.subr.mxu0 %v3080_v21 }
 0x6e1   :  { %v1437_v20 = vmax.f32 %v1415_v19, 0.0  ;;  %2983 = vmatpush3.msra.mxu0 %v1699_v30  ;;  %v1796_v30 = vld [vmem:[%s3929_s9 + $0x30] sm:$0xff] }
 0x6e2   :  { %2984 = vmatprep.subr.mxu0 %v3080_v21 }
 0x6e3   :  { %2920 = vmatprep.mubr.f32.mxu0 %v1437_v20  ;;  %2985 = vmatpush3.msra.mxu0 %v1698_v32  ;;  %v1795_v32 = vld [vmem:[%s3929_s9 + $0x28] sm:$0xff] }
 0x6e4   :  { %2921 = vmatmul.mubr.f32.gmra.mxu0 %v1438_v17  ;;  %2986 = vmatprep.subr.mxu0 %v3080_v21 }
 0x6e5   :  { %2990 = vmatprep.mubr.msk.f32.mxu0 %vm3081_vm0, %v3080_v21  ;;  %2987 = vmatpush3.msra.mxu0 %v1697_v34  ;;  %v1794_v34 = vld [vmem:[%s3929_s9 + $0x20] sm:$0xff] }
 0x6e6   :  { %2988 = vmatprep.subr.mxu0 %v3080_v21 }
 0x6e7   :  { %2989 = vmatpush3.msra.mxu0 %v1696_v35  ;;  %v1793_v35 = vld [vmem:[%s3929_s9 + $0x18] sm:$0xff] }
 0x6e8   :  { %3028 = vmatprep.subr.mxu0 %v3080_v21 }
 0x788   :  { %v3748_v36 = vpop.f32.mrf.mxu0 }
 0x789   :  { %v1536_v18 = vadd.f32 %v3748_v36, %v2059_v52  ;;  %v1899_v36 = vld [vmem:[%s3930_s11 + $0x78] sm:$0xff] }
 0x78a   :  { %v3750_v37 = vpop.f32.mrf.mxu0 }
 0x78b   :  { %v1531_v20 = vadd.f32 %v2059_v52, %v3750_v37  ;;  %v1610_v22 = vmax.f32 %v1536_v18, 0.0 }
 0x78c   :  { %v2904_v38 = vpop.f32.mrf.mxu0 }
 0x78d   :  { %v1546_v13 = vadd.f32 %v2904_v38, %v2059_v52  ;;  %v1609_v23 = vmax.f32 %v1531_v20, 0.0  ;;  %v1898_v38 = vld [vmem:[%s3930_s11 + $0x70] sm:$0xff] }
 0x78e   :  { %v1540_v39 = vpop.f32.mrf.mxu0 }
 0x78f   :  { %v1541_v15 = vadd.f32 %v2059_v52, %v1540_v39  ;;  %v1612_v19 = vmax.f32 %v1546_v13, 0.0 }
 0x790   :  { %v2907_v40 = vpop.f32.mrf.mxu0 }
 0x791   :  { %v1556_v9 = vadd.f32 %v2907_v40, %v2059_v52  ;;  %v1611_v17 = vmax.f32 %v1541_v15, 0.0  ;;  %v1897_v40 = vld [vmem:[%s3930_s11 + $0x68] sm:$0xff] }
 0x792   :  { %v1550_v41 = vpop.f32.mrf.mxu0 }
 0x793   :  { %v1551_v11 = vadd.f32 %v2059_v52, %v1550_v41  ;;  %v1614_v14 = vmax.f32 %v1556_v9, 0.0  ;;  %v1896_v41 = vld [vmem:[%s3930_s11 + $0x60] sm:$0xff] }
 0x794   :  { %v2910_v42 = vpop.f32.mrf.mxu0 }
 0x795   :  { %v1566_v5 = vadd.f32 %v2910_v42, %v2059_v52  ;;  %v1613_v16 = vmax.f32 %v1551_v11, 0.0  ;;  %v1895_v42 = vld [vmem:[%s3930_s11 + $0x58] sm:$0xff] }
 0x796   :  { %v1560_v43 = vpop.f32.mrf.mxu0 }
 0x797   :  { %v1561_v7 = vadd.f32 %v2059_v52, %v1560_v43  ;;  %v1616_v10 = vmax.f32 %v1566_v5, 0.0  ;;  %v1894_v43 = vld [vmem:[%s3930_s11 + $0x50] sm:$0xff] }
 0x798   :  { %v2913_v44 = vpop.f32.mrf.mxu0 }
 0x799   :  { %v1576_v1 = vadd.f32 %v2913_v44, %v2059_v52  ;;  %v1615_v12 = vmax.f32 %v1561_v7, 0.0  ;;  %v1893_v44 = vld [vmem:[%s3930_s11 + $0x48] sm:$0xff] }
 0x79a   :  { %v1570_v45 = vpop.f32.mrf.mxu0 }
 0x79b   :  { %v1571_v2 = vadd.f32 %v2059_v52, %v1570_v45  ;;  %v1618_v6 = vmax.f32 %v1576_v1, 0.0  ;;  %v1892_v45 = vld [vmem:[%s3930_s11 + $0x40] sm:$0xff] }
 0x79c   :  { %v2916_v47 = vpop.f32.mrf.mxu0 }
 0x79d   :  { %v1586_v61 = vadd.f32 %v2916_v47, %v2059_v52  ;;  %v1617_v8 = vmax.f32 %v1571_v2, 0.0  ;;  %v1891_v47 = vld [vmem:[%s3930_s11 + $0x38] sm:$0xff] }
 0x79e   :  { %v1580_v48 = vpop.f32.mrf.mxu0 }
 0x79f   :  { %v1581_v63 = vadd.f32 %v2059_v52, %v1580_v48  ;;  %v1620_v4 = vmax.f32 %v1586_v61, 0.0  ;;  %v1890_v48 = vld [vmem:[%s3930_s11 + $0x30] sm:$0xff] }
 0x7a0   :  { %v2919_v50 = vpop.f32.mrf.mxu0 }
 0x7a1   :  { %v1596_v56 = vadd.f32 %v2919_v50, %v2059_v52  ;;  %v1619_v3 = vmax.f32 %v1581_v63, 0.0  ;;  %v1889_v50 = vld [vmem:[%s3930_s11 + $0x28] sm:$0xff] }
 0x7a2   :  { %v1590_v51 = vpop.f32.mrf.mxu0 }
 0x7a3   :  { %v1591_v59 = vadd.f32 %v2059_v52, %v1590_v51  ;;  %v1622_v62 = vmax.f32 %v1596_v56, 0.0  ;;  %v1888_v51 = vld [vmem:[%s3930_s11 + $0x20] sm:$0xff]  ;;  %v1792_v56 = vld [vmem:[%s3929_s9 + $0x10] sm:$0xff] }
 0x7a4   :  { %v2922_v53 = vpop.f32.mrf.mxu0 }
 0x7a5   :  { %v1606_v54 = vadd.f32 %v2922_v53, %v2059_v52  ;;  %v1621_v0 = vmax.f32 %v1591_v59, 0.0  ;;  %v1886_v53 = vld [vmem:[%s3930_s11 + $0x10] sm:$0xff]  ;;  %v2060_v59 = vld [vmem:[%s3931_s8] ss:$0 sm:$0xff] }
 0x7a6   :  { %v1600_v55 = vpop.f32.mrf.mxu0 }
 0x7a7   :  { %v1624_v57 = vmax.f32 %v1606_v54, 0.0  ;;  %v1601_v58 = vadd.f32 %v2059_v52, %v1600_v55  ;;  %v1887_v52 = vld [vmem:[%s3930_s11 + $0x18] sm:$0xff]  ;;  %v1885_v54 = vld [vmem:[%s3930_s11 + $0x8] sm:$0xff]  ;;  %v1884_v55 = vld [vmem:[%s3930_s11] sm:$0xff] }
 0x7a9   :  { %v1623_v60 = vmax.f32 %v1601_v58, 0.0  ;;  %2924 = vmatpush3.msra.mxu1 %v1624_v57  ;;  %v1791_v57 = vld [vmem:[%s3929_s9 + $0x8] sm:$0xff]  ;;  %v1790_v58 = vld [vmem:[%s3929_s9] sm:$0xff] }
 0x7aa   :  { %2925 = vmatprep.subr.mxu1 %v3080_v21 }
 0x7ab   :  { %2926 = vmatpush3.msra.mxu1 %v1623_v60 }
 0x7ac   :  { %2927 = vmatprep.subr.mxu1 %v3080_v21 }
 0x7ad   :  { %2928 = vmatpush3.msra.mxu1 %v1622_v62 }
 0x7ae   :  { %2929 = vmatprep.subr.mxu1 %v3080_v21 }
 0x7af   :  { %2930 = vmatpush3.msra.mxu1 %v1621_v0  ;;  %v2062_v0 = vld [vmem:[%s3932_s12] ss:$0 sm:$0xff] }
 0x7b0   :  { %2931 = vmatprep.subr.mxu1 %v3080_v21 }
 0x7b1   :  { %2932 = vmatpush3.msra.mxu1 %v1620_v4 }
 0x7b2   :  { %2933 = vmatprep.subr.mxu1 %v3080_v21 }
 0x7b3   :  { %2934 = vmatpush3.msra.mxu1 %v1619_v3 }
 0x7b4   :  { %2935 = vmatprep.subr.mxu1 %v3080_v21 }
 0x7b5   :  { %2936 = vmatpush3.msra.mxu1 %v1618_v6 }
 0x7b6   :  { %2937 = vmatprep.subr.mxu1 %v3080_v21 }
 0x7b7   :  { %2938 = vmatpush3.msra.mxu1 %v1617_v8 }
 0x7b8   :  { %2939 = vmatprep.subr.mxu1 %v3080_v21 }
 0x7b9   :  { %2940 = vmatpush3.msra.mxu1 %v1616_v10 }
 0x7ba   :  { %2941 = vmatprep.subr.mxu1 %v3080_v21 }
 0x7bb   :  { %2942 = vmatpush3.msra.mxu1 %v1615_v12 }
 0x7bc   :  { %2943 = vmatprep.subr.mxu1 %v3080_v21 }
 0x7bd   :  { %2944 = vmatpush3.msra.mxu1 %v1614_v14 }
 0x7be   :  { %2945 = vmatprep.subr.mxu1 %v3080_v21 }
 0x7bf   :  { %2946 = vmatpush3.msra.mxu1 %v1613_v16 }
 0x7c0   :  { %2947 = vmatprep.subr.mxu1 %v3080_v21 }
 0x7c1   :  { %2948 = vmatpush3.msra.mxu1 %v1612_v19 }
 0x7c2   :  { %2949 = vmatprep.subr.mxu1 %v3080_v21 }
 0x7c3   :  { %2950 = vmatpush3.msra.mxu1 %v1611_v17 }
 0x7c4   :  { %2951 = vmatprep.subr.mxu1 %v3080_v21 }
 0x7c5   :  { %2952 = vmatpush3.msra.mxu1 %v1610_v22 }
 0x7c6   :  { %2953 = vmatprep.subr.mxu1 %v3080_v21 }
 0x7c7   :  { %2954 = vmatpush3.msra.mxu1 %v1609_v23 }
 0x7c8   :  { %2956 = vmatmul.mubr.f32.vlgmr.msra.gmra.mxu1 %v1625_v24  ;;  %2993 = vmatprep.subr.mxu1 %v3080_v21 }
 0x7c9   :  { %3025 = vmatprep.mubr.msk.f32.mxu1 %vm3081_vm0, %v3080_v21  ;;  %2994 = vmatpush3.msra.mxu1 %v1805_v25 }
 0x7ca   :  { %2995 = vmatprep.subr.mxu1 %v3080_v21 }
 0x7cb   :  { %2996 = vmatpush3.msra.mxu1 %v1804_v26 }
 0x7cc   :  { %2997 = vmatprep.subr.mxu1 %v3080_v21 }
 0x7cd   :  { %2998 = vmatpush3.msra.mxu1 %v1803_v27 }
 0x7ce   :  { %2999 = vmatprep.subr.mxu1 %v3080_v21 }
 0x7cf   :  { %3000 = vmatpush3.msra.mxu1 %v1802_v29 }
 0x7d0   :  { %3001 = vmatprep.subr.mxu1 %v3080_v21 }
 0x7d1   :  { %3002 = vmatpush3.msra.mxu1 %v1801_v31 }
 0x7d2   :  { %3003 = vmatprep.subr.mxu1 %v3080_v21 }
 0x7d3   :  { %3004 = vmatpush3.msra.mxu1 %v1800_v33 }
 0x7d4   :  { %3005 = vmatprep.subr.mxu1 %v3080_v21 }
 0x7d5   :  { %3006 = vmatpush3.msra.mxu1 %v1799_v46 }
 0x7d6   :  { %3007 = vmatprep.subr.mxu1 %v3080_v21 }
 0x7d7   :  { %3008 = vmatpush3.msra.mxu1 %v1798_v49 }
 0x7d8   :  { %3009 = vmatprep.subr.mxu1 %v3080_v21 }
 0x7d9   :  { %3010 = vmatpush3.msra.mxu1 %v1797_v28 }
 0x7da   :  { %3011 = vmatprep.subr.mxu1 %v3080_v21 }
 0x7db   :  { %3012 = vmatpush3.msra.mxu1 %v1796_v30 }
 0x7dc   :  { %3013 = vmatprep.subr.mxu1 %v3080_v21 }
 0x7dd   :  { %3014 = vmatpush3.msra.mxu1 %v1795_v32 }
 0x7de   :  { %3015 = vmatprep.subr.mxu1 %v3080_v21 }
 0x7df   :  { %3016 = vmatpush3.msra.mxu1 %v1794_v34 }
 0x7e0   :  { %3017 = vmatprep.subr.mxu1 %v3080_v21 }
 0x7e1   :  { %3018 = vmatpush3.msra.mxu1 %v1793_v35 }
 0x7e2   :  { %3019 = vmatprep.subr.mxu1 %v3080_v21 }
 0x7e3   :  { %3020 = vmatpush3.msra.mxu1 %v1792_v56 }
 0x7e4   :  { %3021 = vmatprep.subr.mxu1 %v3080_v21 }
 0x7e5   :  { %3022 = vmatpush3.msra.mxu1 %v1791_v57 }
 0x7e6   :  { %3023 = vmatprep.subr.mxu1 %v3080_v21 }
 0x7e7   :  { %3024 = vmatpush3.msra.mxu1 %v1790_v58 }
 0x888   :  { %v1692_v37 = vpop.f32.mrf.mxu1 }
 0x889   :  { %2991 = vmatmul.mubr.f32.vlgmr.msra.gmra.mxu0 %v1692_v37 }
 0x88a   :  { %3029 = vmatpush3.msra.mxu0 %v1899_v36  ;;  %v2957_v39 = vpop.f32.mrf.mxu1  ;;  %3060 = vmatprep.mubr.msk.f32.mxu0 %vm3081_vm0, %v3080_v21 }
 0x88b   :  { %3030 = vmatprep.subr.mxu0 %v3080_v21 }
 0x88c   :  { %3031 = vmatpush3.msra.mxu0 %v1898_v38 }
 0x88d   :  { %3032 = vmatprep.subr.mxu0 %v3080_v21 }
 0x88e   :  { %3033 = vmatpush3.msra.mxu0 %v1897_v40 }
 0x88f   :  { %3034 = vmatprep.subr.mxu0 %v3080_v21 }
 0x890   :  { %3035 = vmatpush3.msra.mxu0 %v1896_v41 }
 0x891   :  { %3036 = vmatprep.subr.mxu0 %v3080_v21 }
 0x892   :  { %3037 = vmatpush3.msra.mxu0 %v1895_v42 }
 0x893   :  { %3038 = vmatprep.subr.mxu0 %v3080_v21 }
 0x894   :  { %3039 = vmatpush3.msra.mxu0 %v1894_v43 }
 0x895   :  { %3040 = vmatprep.subr.mxu0 %v3080_v21 }
 0x896   :  { %3041 = vmatpush3.msra.mxu0 %v1893_v44 }
 0x897   :  { %3042 = vmatprep.subr.mxu0 %v3080_v21 }
 0x898   :  { %3043 = vmatpush3.msra.mxu0 %v1892_v45 }
 0x899   :  { %3044 = vmatprep.subr.mxu0 %v3080_v21 }
 0x89a   :  { %3045 = vmatpush3.msra.mxu0 %v1891_v47 }
 0x89b   :  { %3046 = vmatprep.subr.mxu0 %v3080_v21 }
 0x89c   :  { %3047 = vmatpush3.msra.mxu0 %v1890_v48 }
 0x89d   :  { %3048 = vmatprep.subr.mxu0 %v3080_v21 }
 0x89e   :  { %3049 = vmatpush3.msra.mxu0 %v1889_v50 }
 0x89f   :  { %3050 = vmatprep.subr.mxu0 %v3080_v21 }
 0x8a0   :  { %3051 = vmatpush3.msra.mxu0 %v1888_v51 }
 0x8a1   :  { %3052 = vmatprep.subr.mxu0 %v3080_v21 }
 0x8a2   :  { %3053 = vmatpush3.msra.mxu0 %v1887_v52 }
 0x8a3   :  { %3054 = vmatprep.subr.mxu0 %v3080_v21 }
 0x8a4   :  { %3055 = vmatpush3.msra.mxu0 %v1886_v53 }
 0x8a5   :  { %3056 = vmatprep.subr.mxu0 %v3080_v21 }
 0x8a6   :  { %3057 = vmatpush3.msra.mxu0 %v1885_v54 }
 0x8a7   :  { %3058 = vmatprep.subr.mxu0 %v3080_v21  ;;  %v2061_v21 = vld [vmem:[%s3934_s10] ss:$0 sm:$0xff] }
 0x8a8   :  { %3059 = vmatpush3.msra.mxu0 %v1884_v55 }
 0x8a9   :  { %3061 = vmatmul.mubr.f32.vlgmr.msra.gmra.mxu0 %v1692_v37 }
 0x949   :  { %v1785_v60 = vpop.f32.mrf.mxu0 }
 0x94a   :  { %v1786_v61 = vadd.f32 %v2060_v59, %v1785_v60 }
 0x94b   :  { %v2992_v62 = vpop.f32.mrf.mxu0 }
 0x94c   :  { %v1789_v63 = vmax.f32 %v1786_v61, 0.0 }
 0x94e   :  { %3026 = vmatmul.mubr.f32.vlgmr.msra.gmra.mxu1 %v1789_v63 }
 0x969   :  { %v1973_v1 = vpop.f32.mrf.mxu0 }
 0x96a   :  { %v1974_v4 = vadd.f32 %v2062_v0, %v1973_v1 }
 0x96b   :  { %v3062_v2 = vpop.f32.mrf.mxu0 }
 0x96c   :  { %1977 = vst [vmem:[%s3933_s14] sm:$0xff] %v1974_v4 }
 0xa0e   :  { %v1879_v3 = vpop.f32.mrf.mxu1 }
 0xa0f   :  { %v1880_v5 = vadd.f32 %v2061_v21, %v1879_v3 }
 0xa10   :  { %v3027_v6 = vpop.f32.mrf.mxu1 }
 0xa11   :  { %1883 = vst [vmem:[%s3935_s13] sm:$0xff] %v1880_v5 }

</bundles_post_ra>
